<compile_context>
chip_gen: v6e
topology: v6e:2x2x1
jax: 0.10.0
libtpu: 0.0.40
codegen_flags: <defaults>
</compile_context>

<pallas_src>
import functools

import jax
import jax.numpy as jnp
from jax.experimental import pallas as pl
from jax.experimental.pallas import tpu as pltpu


def _default_batch_tile(batch):
    """Largest divisor of `batch` that still leaves >=2 grid steps (v7x 2 TCs)."""
    if batch <= 1:
        return max(batch, 1)
    target = max(1, batch // 2)
    for bt in range(target, 0, -1):
        if batch % bt == 0:
            return bt
    return 1


def _stacked_atrous_kernel(x_ref, w_ref, b_ref, o_ref, xpad_ref, patch_ref, *,
                           starts, Bt, Cin, Cin_pad, H, W, Wp, HWr, max_pad):
    """One grid step = `Bt` batch elements.

    x_ref     : (Bt, Cin, H*W)       f32   un-padded activations, flat spatial
    w_ref     : (Cout, T*Cin_pad)    bf16  fused (atrous @ lin) weights
    b_ref     : (Cout, 1)            f32   fused bias
    o_ref     : (Bt, Cout, H*W)      f32   W-exact output rows, flat spatial
    xpad_ref  : (Bt, Cin_pad, Lr)    bf16  scratch: flat zero-padded input
    patch_ref : (T*Cin_pad, Bt*HWr)  bf16  scratch: im2col operand
    """
    # 1) Zero the flat-padded staging buffer.  Halo pixels, the padded
    #    channels [Cin, Cin_pad) and the lane-rounding slack all stay exactly
    #    zero.  Re-done every step -> correct under megacore grid sharding.
    xpad_ref[...] = jnp.zeros_like(xpad_ref)

    # 2) Scatter the un-padded image rows into the padded flat layout, casting
    #    f32 -> bf16 on the fly (replaces the wrapper-side pad + cast ops).
    row0 = max_pad + max_pad * Wp + max_pad        # flat offset of pixel (0, 0)
    for b in range(Bt):
        for h in range(H):
            dst = row0 + h * Wp
            xpad_ref[b, 0:Cin, dst:dst + W] = (
                x_ref[b, :, h * W:(h + 1) * W].astype(xpad_ref.dtype))

    # 3) im2col: every conv tap is ONE contiguous slice of the flat-padded
    #    buffer.  Destinations are full-sublane (Cin_pad) and 128-lane (HWr)
    #    aligned, so these stores are unmasked.
    for t, s in enumerate(starts):
        r0 = t * Cin_pad
        for b in range(Bt):
            patch_ref[r0:r0 + Cin_pad, b * HWr:(b + 1) * HWr] = (
                xpad_ref[b, :, s:s + HWr])

    # 4) Single deep-K MXU matmul over all taps / rates / batch elements of
    #    this step, f32 accumulation, fused bias.
    acc = jnp.dot(w_ref[...], patch_ref[...],
                  preferred_element_type=jnp.float32)       # (Cout, Bt*HWr)
    acc = acc + b_ref[...]

    # 5) Emit W-exact output rows (valid columns only) -> no wrapper slice.
    for b in range(Bt):
        for h in range(H):
            c0 = b * HWr + h * Wp + max_pad
            o_ref[b, :, h * W:(h + 1) * W] = acc[:, c0:c0 + W].astype(o_ref.dtype)


def fuse_atrous_params(wat, bat, wlin, blin, *, sublane=8):
    """Fold the 1x1 `lin` conv into the per-tap atrous weights (exact: linear).

    Call ONCE at parameter-load time, not per forward pass.

    wat  : (n_rates, K, K, Cin, Cin)  per-rate dilated conv weights (HWIO)
    bat  : (n_rates, Cin)             per-rate dilated conv biases
    wlin : (n_rates*Cin, Cout)        1x1 conv weights
    blin : (1, Cout)                  1x1 conv bias
    returns (w_fused_t bf16 (Cout, T*Cin_pad), b_fused f32 (Cout, 1))
    """
    n_rates, K, K2, Cin, Cin_o = wat.shape
    assert K == K2 and Cin == Cin_o
    Cout = wlin.shape[1]
    Cin_pad = -(-Cin // sublane) * sublane         # sublane-aligned channel count

    wlin_r = wlin.reshape(n_rates, Cin, Cout)                      # per-rate slice
    w_fused = jnp.einsum('rykio,roc->rykic', wat, wlin_r)          # (R,K,K,Cin,Cout)
    w_fused = jnp.pad(w_fused,
                      ((0, 0), (0, 0), (0, 0), (0, Cin_pad - Cin), (0, 0)))
    w_fused_t = w_fused.reshape(n_rates * K * K * Cin_pad, Cout).T
    w_fused_t = w_fused_t.astype(jnp.bfloat16)                     # (Cout, T*Cin_pad)

    b_fused = jnp.einsum('ro,roc->c', bat, wlin_r) + blin.reshape(-1)
    b_fused = b_fused.reshape(Cout, 1).astype(jnp.float32)
    return w_fused_t, b_fused


def stacked_atrous_convs(x_nchw, w_fused_t, b_fused, rates, kernel_size=3, *,
                         batch_tile=None, out_dtype=None,
                         vmem_limit_bytes=48 * 1024 * 1024):
    """Forward pass of StackedAtrousConvs with pre-fused parameters.

    x_nchw : (B, Cin, H, W) -> (B, Cout, H, W)
    """
    B, Cin, H, W = x_nchw.shape
    n_rates = len(rates)
    K = kernel_size
    # The flat-padded "tap = contiguous 1-D slice" trick needs an odd kernel
    # and max_pad = (K//2)*max(rate) of implicit spatial zero padding.
    assert K % 2 == 1, "odd kernel size required"
    assert all(int(r) >= 1 for r in rates)

    Cout, Kdepth = w_fused_t.shape
    T = n_rates * K * K
    assert Kdepth % T == 0, "fused weights do not match rates/kernel_size"
    Cin_pad = Kdepth // T
    assert Cin_pad >= Cin

    half = K // 2
    max_pad = half * max(rates)
    Wp = W + 2 * max_pad                      # padded row width
    HWp = H * Wp                              # flat output cols per element (incl. wrap)
    HWr = -(-HWp // 128) * 128                # lane-aligned per-element column block

    # Static flat offsets of each conv tap (rate-major, then ky, kx).
    starts = []
    for r in rates:
        for ky in range(K):
            for kx in range(K):
                dy = (ky - half) * r
                dx = (kx - half) * r
                starts.append(max_pad + (max_pad + dy) * Wp + dx)
    assert min(starts) >= 0
    Lr = max(starts) + HWr                    # flat-padded length per element

    if batch_tile is None:
        batch_tile = _default_batch_tile(B)
    Bt = batch_tile
    assert B % Bt == 0
    grid = (B // Bt,)

    if out_dtype is None:
        out_dtype = x_nchw.dtype              # pass jnp.bfloat16 to halve output writeback

    kern = functools.partial(
        _stacked_atrous_kernel, starts=tuple(starts), Bt=Bt, Cin=Cin,
        Cin_pad=Cin_pad, H=H, W=W, Wp=Wp, HWr=HWr, max_pad=max_pad)

    # Free row-major merge of (H, W) -> H*W; no data movement.
    x_flat = x_nchw.reshape(B, Cin, H * W)

    out_flat = pl.pallas_call(
        kern,
        out_shape=jax.ShapeDtypeStruct((B, Cout, H * W), out_dtype),
        grid=grid,
        in_specs=[
            pl.BlockSpec((Bt, Cin, H * W), lambda g: (g, 0, 0)),
            pl.BlockSpec((Cout, Kdepth), lambda g: (0, 0)),
            pl.BlockSpec((Cout, 1), lambda g: (0, 0)),
        ],
        out_specs=pl.BlockSpec((Bt, Cout, H * W), lambda g: (g, 0, 0)),
        scratch_shapes=[
            pltpu.VMEM((Bt, Cin_pad, Lr), jnp.bfloat16),
            pltpu.VMEM((T * Cin_pad, Bt * HWr), jnp.bfloat16),
        ],
        compiler_params=pltpu.CompilerParams(
            dimension_semantics=("parallel",),
            vmem_limit_bytes=vmem_limit_bytes),
    )(x_flat, w_fused_t, b_fused)

    # Free row-major split back to NCHW.
    return out_flat.reshape(B, Cout, H, W)


def _reference_forward(x_nchw, wat, bat, wlin, blin, rates):
    """Pure-JAX reference (lax dilated conv) for correctness checking."""
    x = jnp.transpose(x_nchw, (0, 2, 3, 1))              # NHWC
    feats = []
    for ri, r in enumerate(rates):
        y = jax.lax.conv_general_dilated(
            x, wat[ri], window_strides=(1, 1),
            padding=[(r, r), (r, r)], rhs_dilation=(r, r),
            dimension_numbers=("NHWC", "HWIO", "NHWC"))
        feats.append(y + bat[ri])
    f = jnp.concatenate(feats, axis=-1)
    out = jnp.einsum("bhwc,cd->bhwd", f, wlin) + blin[0]
    return jnp.transpose(out, (0, 3, 1, 2))              # NCHW


if __name__ == "__main__":
    # Module config: StackedAtrousConvs("1,2", Cin=4, Cout=8, bias=True, k=3)
    rates = [1, 2]
    B, Cin, Cout, H, W, K = 2, 4, 8, 16, 16, 3
    n_rates = len(rates)

    key = jax.random.PRNGKey(0)
    k1, k2, k3, k4, k5 = jax.random.split(key, 5)

    x = jax.random.normal(k1, (B, Cin, H, W), dtype=jnp.float32)
    wat = 0.1 * jax.random.normal(k2, (n_rates, K, K, Cin, Cin),
                                  dtype=jnp.float32)
    bat = 0.1 * jax.random.normal(k3, (n_rates, Cin), dtype=jnp.float32)
    wlin = 0.1 * jax.random.normal(k4, (n_rates * Cin, Cout),
                                   dtype=jnp.float32)
    blin = 0.1 * jax.random.normal(k5, (1, Cout), dtype=jnp.float32)

    # Parameter fusion happens once, off the per-call hot path.
    w_fused_t, b_fused = fuse_atrous_params(wat, bat, wlin, blin)
    w_fused_t = jax.block_until_ready(w_fused_t)

    fwd = jax.jit(functools.partial(stacked_atrous_convs,
                                    rates=rates, kernel_size=K))
    out = fwd(x, w_fused_t, b_fused)
    out = jax.block_until_ready(out)

    ref = _reference_forward(x, wat, bat, wlin, blin, rates)
    assert out.shape == (B, Cout, H, W), out.shape
    # bf16 matmul operands with f32 accumulation -> loosened tolerance.
    max_err = float(jnp.max(jnp.abs(out - ref)))
    assert jnp.allclose(out, ref, atol=2e-2, rtol=2e-2), max_err

    print("KERNEL_OK")
</pallas_src>

<mosaic_0001>
module attributes {stable_mosaic.version = 11 : i64} {
  func.func @_stacked_atrous_kernel(%arg0: i32, %arg1: memref<1x4x256xf32, #tpu.memory_space<vmem>>, %arg2: memref<8x144xbf16, #tpu.memory_space<vmem>>, %arg3: memref<8x1xf32, #tpu.memory_space<vmem>>, %arg4: memref<1x8x256xf32, #tpu.memory_space<vmem>>, %arg5: memref<1x8x468xbf16, #tpu.memory_space<vmem>>, %arg6: memref<144x384xbf16, #tpu.memory_space<vmem>>) attributes {dimension_semantics = [#tpu.dimension_semantics<parallel>], iteration_bounds = array<i64: 2>, scalar_prefetch = 0 : i64, scratch_operands = 2 : i64, tpu.core_type = #tpu.core_type<tc>, window_params = [{transform_indices = @transform_0, window_bounds = array<i64: 1, 4, 256>}, {pipeline_mode = #tpu.pipeline_mode<synchronous>, transform_indices = @transform_1, window_bounds = array<i64: 8, 144>}, {pipeline_mode = #tpu.pipeline_mode<synchronous>, transform_indices = @transform_2, window_bounds = array<i64: 8, 1>}, {transform_indices = @transform_3, window_bounds = array<i64: 1, 8, 256>}]} {
    %cst = arith.constant 0.000000e+00 : bf16
    %0 = vector.broadcast %cst : bf16 to vector<1x8x468xbf16>
    %c0 = arith.constant 0 : index
    %c0_0 = arith.constant 0 : index
    %c0_1 = arith.constant 0 : index
    %1 = vector.load %arg5[%c0, %c0_0, %c0_1] : memref<1x8x468xbf16, #tpu.memory_space<vmem>>, vector<1x8x468xbf16>
    tpu.vector_store %arg5[%c0, %c0_0, %c0_1], %0 {strides = array<i32>} : memref<1x8x468xbf16, #tpu.memory_space<vmem>>, vector<1x8x468xbf16>,
    %c0_2 = arith.constant 0 : index
    %c0_3 = arith.constant 0 : index
    %c0_4 = arith.constant 0 : index
    %2 = vector.load %arg1[%c0_2, %c0_3, %c0_4] : memref<1x4x256xf32, #tpu.memory_space<vmem>>, vector<1x4x16xf32>
    %3 = vector.shape_cast %2 : vector<1x4x16xf32> to vector<4x16xf32>
    %4 = arith.truncf %3 : vector<4x16xf32> to vector<4x16xbf16>
    %c0_5 = arith.constant 0 : index
    %c0_6 = arith.constant 0 : index
    %c44 = arith.constant 44 : index
    %5 = vector.load %arg5[%c0_5, %c0_6, %c44] : memref<1x8x468xbf16, #tpu.memory_space<vmem>>, vector<1x4x16xbf16>
    %6 = vector.shape_cast %5 : vector<1x4x16xbf16> to vector<4x16xbf16>
    %7 = vector.shape_cast %4 : vector<4x16xbf16> to vector<1x4x16xbf16>
    tpu.vector_store %arg5[%c0_5, %c0_6, %c44], %7 {strides = array<i32>} : memref<1x8x468xbf16, #tpu.memory_space<vmem>>, vector<1x4x16xbf16>,
    %c0_7 = arith.constant 0 : index
    %c0_8 = arith.constant 0 : index
    %c16 = arith.constant 16 : index
    %8 = vector.load %arg1[%c0_7, %c0_8, %c16] : memref<1x4x256xf32, #tpu.memory_space<vmem>>, vector<1x4x16xf32>
    %9 = vector.shape_cast %8 : vector<1x4x16xf32> to vector<4x16xf32>
    %10 = arith.truncf %9 : vector<4x16xf32> to vector<4x16xbf16>
    %c0_9 = arith.constant 0 : index
    %c0_10 = arith.constant 0 : index
    %c64 = arith.constant 64 : index
    %11 = vector.load %arg5[%c0_9, %c0_10, %c64] : memref<1x8x468xbf16, #tpu.memory_space<vmem>>, vector<1x4x16xbf16>
    %12 = vector.shape_cast %11 : vector<1x4x16xbf16> to vector<4x16xbf16>
    %13 = vector.shape_cast %10 : vector<4x16xbf16> to vector<1x4x16xbf16>
    tpu.vector_store %arg5[%c0_9, %c0_10, %c64], %13 {strides = array<i32>} : memref<1x8x468xbf16, #tpu.memory_space<vmem>>, vector<1x4x16xbf16>,
    %c0_11 = arith.constant 0 : index
    %c0_12 = arith.constant 0 : index
    %c32 = arith.constant 32 : index
    %14 = vector.load %arg1[%c0_11, %c0_12, %c32] : memref<1x4x256xf32, #tpu.memory_space<vmem>>, vector<1x4x16xf32>
    %15 = vector.shape_cast %14 : vector<1x4x16xf32> to vector<4x16xf32>
    %16 = arith.truncf %15 : vector<4x16xf32> to vector<4x16xbf16>
    %c0_13 = arith.constant 0 : index
    %c0_14 = arith.constant 0 : index
    %c84 = arith.constant 84 : index
    %17 = vector.load %arg5[%c0_13, %c0_14, %c84] : memref<1x8x468xbf16, #tpu.memory_space<vmem>>, vector<1x4x16xbf16>
    %18 = vector.shape_cast %17 : vector<1x4x16xbf16> to vector<4x16xbf16>
    %19 = vector.shape_cast %16 : vector<4x16xbf16> to vector<1x4x16xbf16>
    tpu.vector_store %arg5[%c0_13, %c0_14, %c84], %19 {strides = array<i32>} : memref<1x8x468xbf16, #tpu.memory_space<vmem>>, vector<1x4x16xbf16>,
    %c0_15 = arith.constant 0 : index
    %c0_16 = arith.constant 0 : index
    %c48 = arith.constant 48 : index
    %20 = vector.load %arg1[%c0_15, %c0_16, %c48] : memref<1x4x256xf32, #tpu.memory_space<vmem>>, vector<1x4x16xf32>
    %21 = vector.shape_cast %20 : vector<1x4x16xf32> to vector<4x16xf32>
    %22 = arith.truncf %21 : vector<4x16xf32> to vector<4x16xbf16>
    %c0_17 = arith.constant 0 : index
    %c0_18 = arith.constant 0 : index
    %c104 = arith.constant 104 : index
    %23 = vector.load %arg5[%c0_17, %c0_18, %c104] : memref<1x8x468xbf16, #tpu.memory_space<vmem>>, vector<1x4x16xbf16>
    %24 = vector.shape_cast %23 : vector<1x4x16xbf16> to vector<4x16xbf16>
    %25 = vector.shape_cast %22 : vector<4x16xbf16> to vector<1x4x16xbf16>
    tpu.vector_store %arg5[%c0_17, %c0_18, %c104], %25 {strides = array<i32>} : memref<1x8x468xbf16, #tpu.memory_space<vmem>>, vector<1x4x16xbf16>,
    %c0_19 = arith.constant 0 : index
    %c0_20 = arith.constant 0 : index
    %c64_21 = arith.constant 64 : index
    %26 = vector.load %arg1[%c0_19, %c0_20, %c64_21] : memref<1x4x256xf32, #tpu.memory_space<vmem>>, vector<1x4x16xf32>
    %27 = vector.shape_cast %26 : vector<1x4x16xf32> to vector<4x16xf32>
    %28 = arith.truncf %27 : vector<4x16xf32> to vector<4x16xbf16>
    %c0_22 = arith.constant 0 : index
    %c0_23 = arith.constant 0 : index
    %c124 = arith.constant 124 : index
    %29 = vector.load %arg5[%c0_22, %c0_23, %c124] : memref<1x8x468xbf16, #tpu.memory_space<vmem>>, vector<1x4x16xbf16>
    %30 = vector.shape_cast %29 : vector<1x4x16xbf16> to vector<4x16xbf16>
    %31 = vector.shape_cast %28 : vector<4x16xbf16> to vector<1x4x16xbf16>
    tpu.vector_store %arg5[%c0_22, %c0_23, %c124], %31 {strides = array<i32>} : memref<1x8x468xbf16, #tpu.memory_space<vmem>>, vector<1x4x16xbf16>,
    %c0_24 = arith.constant 0 : index
    %c0_25 = arith.constant 0 : index
    %c80 = arith.constant 80 : index
    %32 = vector.load %arg1[%c0_24, %c0_25, %c80] : memref<1x4x256xf32, #tpu.memory_space<vmem>>, vector<1x4x16xf32>
    %33 = vector.shape_cast %32 : vector<1x4x16xf32> to vector<4x16xf32>
    %34 = arith.truncf %33 : vector<4x16xf32> to vector<4x16xbf16>
    %c0_26 = arith.constant 0 : index
    %c0_27 = arith.constant 0 : index
    %c144 = arith.constant 144 : index
    %35 = vector.load %arg5[%c0_26, %c0_27, %c144] : memref<1x8x468xbf16, #tpu.memory_space<vmem>>, vector<1x4x16xbf16>
    %36 = vector.shape_cast %35 : vector<1x4x16xbf16> to vector<4x16xbf16>
    %37 = vector.shape_cast %34 : vector<4x16xbf16> to vector<1x4x16xbf16>
    tpu.vector_store %arg5[%c0_26, %c0_27, %c144], %37 {strides = array<i32>} : memref<1x8x468xbf16, #tpu.memory_space<vmem>>, vector<1x4x16xbf16>,
    %c0_28 = arith.constant 0 : index
    %c0_29 = arith.constant 0 : index
    %c96 = arith.constant 96 : index
    %38 = vector.load %arg1[%c0_28, %c0_29, %c96] : memref<1x4x256xf32, #tpu.memory_space<vmem>>, vector<1x4x16xf32>
    %39 = vector.shape_cast %38 : vector<1x4x16xf32> to vector<4x16xf32>
    %40 = arith.truncf %39 : vector<4x16xf32> to vector<4x16xbf16>
    %c0_30 = arith.constant 0 : index
    %c0_31 = arith.constant 0 : index
    %c164 = arith.constant 164 : index
    %41 = vector.load %arg5[%c0_30, %c0_31, %c164] : memref<1x8x468xbf16, #tpu.memory_space<vmem>>, vector<1x4x16xbf16>
    %42 = vector.shape_cast %41 : vector<1x4x16xbf16> to vector<4x16xbf16>
    %43 = vector.shape_cast %40 : vector<4x16xbf16> to vector<1x4x16xbf16>
    tpu.vector_store %arg5[%c0_30, %c0_31, %c164], %43 {strides = array<i32>} : memref<1x8x468xbf16, #tpu.memory_space<vmem>>, vector<1x4x16xbf16>,
    %c0_32 = arith.constant 0 : index
    %c0_33 = arith.constant 0 : index
    %c112 = arith.constant 112 : index
    %44 = vector.load %arg1[%c0_32, %c0_33, %c112] : memref<1x4x256xf32, #tpu.memory_space<vmem>>, vector<1x4x16xf32>
    %45 = vector.shape_cast %44 : vector<1x4x16xf32> to vector<4x16xf32>
    %46 = arith.truncf %45 : vector<4x16xf32> to vector<4x16xbf16>
    %c0_34 = arith.constant 0 : index
    %c0_35 = arith.constant 0 : index
    %c184 = arith.constant 184 : index
    %47 = vector.load %arg5[%c0_34, %c0_35, %c184] : memref<1x8x468xbf16, #tpu.memory_space<vmem>>, vector<1x4x16xbf16>
    %48 = vector.shape_cast %47 : vector<1x4x16xbf16> to vector<4x16xbf16>
    %49 = vector.shape_cast %46 : vector<4x16xbf16> to vector<1x4x16xbf16>
    tpu.vector_store %arg5[%c0_34, %c0_35, %c184], %49 {strides = array<i32>} : memref<1x8x468xbf16, #tpu.memory_space<vmem>>, vector<1x4x16xbf16>,
    %c0_36 = arith.constant 0 : index
    %c0_37 = arith.constant 0 : index
    %c128 = arith.constant 128 : index
    %50 = vector.load %arg1[%c0_36, %c0_37, %c128] : memref<1x4x256xf32, #tpu.memory_space<vmem>>, vector<1x4x16xf32>
    %51 = vector.shape_cast %50 : vector<1x4x16xf32> to vector<4x16xf32>
    %52 = arith.truncf %51 : vector<4x16xf32> to vector<4x16xbf16>
    %c0_38 = arith.constant 0 : index
    %c0_39 = arith.constant 0 : index
    %c204 = arith.constant 204 : index
    %53 = vector.load %arg5[%c0_38, %c0_39, %c204] : memref<1x8x468xbf16, #tpu.memory_space<vmem>>, vector<1x4x16xbf16>
    %54 = vector.shape_cast %53 : vector<1x4x16xbf16> to vector<4x16xbf16>
    %55 = vector.shape_cast %52 : vector<4x16xbf16> to vector<1x4x16xbf16>
    tpu.vector_store %arg5[%c0_38, %c0_39, %c204], %55 {strides = array<i32>} : memref<1x8x468xbf16, #tpu.memory_space<vmem>>, vector<1x4x16xbf16>,
    %c0_40 = arith.constant 0 : index
    %c0_41 = arith.constant 0 : index
    %c144_42 = arith.constant 144 : index
    %56 = vector.load %arg1[%c0_40, %c0_41, %c144_42] : memref<1x4x256xf32, #tpu.memory_space<vmem>>, vector<1x4x16xf32>
    %57 = vector.shape_cast %56 : vector<1x4x16xf32> to vector<4x16xf32>
    %58 = arith.truncf %57 : vector<4x16xf32> to vector<4x16xbf16>
    %c0_43 = arith.constant 0 : index
    %c0_44 = arith.constant 0 : index
    %c224 = arith.constant 224 : index
    %59 = vector.load %arg5[%c0_43, %c0_44, %c224] : memref<1x8x468xbf16, #tpu.memory_space<vmem>>, vector<1x4x16xbf16>
    %60 = vector.shape_cast %59 : vector<1x4x16xbf16> to vector<4x16xbf16>
    %61 = vector.shape_cast %58 : vector<4x16xbf16> to vector<1x4x16xbf16>
    tpu.vector_store %arg5[%c0_43, %c0_44, %c224], %61 {strides = array<i32>} : memref<1x8x468xbf16, #tpu.memory_space<vmem>>, vector<1x4x16xbf16>,
    %c0_45 = arith.constant 0 : index
    %c0_46 = arith.constant 0 : index
    %c160 = arith.constant 160 : index
    %62 = vector.load %arg1[%c0_45, %c0_46, %c160] : memref<1x4x256xf32, #tpu.memory_space<vmem>>, vector<1x4x16xf32>
    %63 = vector.shape_cast %62 : vector<1x4x16xf32> to vector<4x16xf32>
    %64 = arith.truncf %63 : vector<4x16xf32> to vector<4x16xbf16>
    %c0_47 = arith.constant 0 : index
    %c0_48 = arith.constant 0 : index
    %c244 = arith.constant 244 : index
    %65 = vector.load %arg5[%c0_47, %c0_48, %c244] : memref<1x8x468xbf16, #tpu.memory_space<vmem>>, vector<1x4x16xbf16>
    %66 = vector.shape_cast %65 : vector<1x4x16xbf16> to vector<4x16xbf16>
    %67 = vector.shape_cast %64 : vector<4x16xbf16> to vector<1x4x16xbf16>
    tpu.vector_store %arg5[%c0_47, %c0_48, %c244], %67 {strides = array<i32>} : memref<1x8x468xbf16, #tpu.memory_space<vmem>>, vector<1x4x16xbf16>,
    %c0_49 = arith.constant 0 : index
    %c0_50 = arith.constant 0 : index
    %c176 = arith.constant 176 : index
    %68 = vector.load %arg1[%c0_49, %c0_50, %c176] : memref<1x4x256xf32, #tpu.memory_space<vmem>>, vector<1x4x16xf32>
    %69 = vector.shape_cast %68 : vector<1x4x16xf32> to vector<4x16xf32>
    %70 = arith.truncf %69 : vector<4x16xf32> to vector<4x16xbf16>
    %c0_51 = arith.constant 0 : index
    %c0_52 = arith.constant 0 : index
    %c264 = arith.constant 264 : index
    %71 = vector.load %arg5[%c0_51, %c0_52, %c264] : memref<1x8x468xbf16, #tpu.memory_space<vmem>>, vector<1x4x16xbf16>
    %72 = vector.shape_cast %71 : vector<1x4x16xbf16> to vector<4x16xbf16>
    %73 = vector.shape_cast %70 : vector<4x16xbf16> to vector<1x4x16xbf16>
    tpu.vector_store %arg5[%c0_51, %c0_52, %c264], %73 {strides = array<i32>} : memref<1x8x468xbf16, #tpu.memory_space<vmem>>, vector<1x4x16xbf16>,
    %c0_53 = arith.constant 0 : index
    %c0_54 = arith.constant 0 : index
    %c192 = arith.constant 192 : index
    %74 = vector.load %arg1[%c0_53, %c0_54, %c192] : memref<1x4x256xf32, #tpu.memory_space<vmem>>, vector<1x4x16xf32>
    %75 = vector.shape_cast %74 : vector<1x4x16xf32> to vector<4x16xf32>
    %76 = arith.truncf %75 : vector<4x16xf32> to vector<4x16xbf16>
    %c0_55 = arith.constant 0 : index
    %c0_56 = arith.constant 0 : index
    %c284 = arith.constant 284 : index
    %77 = vector.load %arg5[%c0_55, %c0_56, %c284] : memref<1x8x468xbf16, #tpu.memory_space<vmem>>, vector<1x4x16xbf16>
    %78 = vector.shape_cast %77 : vector<1x4x16xbf16> to vector<4x16xbf16>
    %79 = vector.shape_cast %76 : vector<4x16xbf16> to vector<1x4x16xbf16>
    tpu.vector_store %arg5[%c0_55, %c0_56, %c284], %79 {strides = array<i32>} : memref<1x8x468xbf16, #tpu.memory_space<vmem>>, vector<1x4x16xbf16>,
    %c0_57 = arith.constant 0 : index
    %c0_58 = arith.constant 0 : index
    %c208 = arith.constant 208 : index
    %80 = vector.load %arg1[%c0_57, %c0_58, %c208] : memref<1x4x256xf32, #tpu.memory_space<vmem>>, vector<1x4x16xf32>
    %81 = vector.shape_cast %80 : vector<1x4x16xf32> to vector<4x16xf32>
    %82 = arith.truncf %81 : vector<4x16xf32> to vector<4x16xbf16>
    %c0_59 = arith.constant 0 : index
    %c0_60 = arith.constant 0 : index
    %c304 = arith.constant 304 : index
    %83 = vector.load %arg5[%c0_59, %c0_60, %c304] : memref<1x8x468xbf16, #tpu.memory_space<vmem>>, vector<1x4x16xbf16>
    %84 = vector.shape_cast %83 : vector<1x4x16xbf16> to vector<4x16xbf16>
    %85 = vector.shape_cast %82 : vector<4x16xbf16> to vector<1x4x16xbf16>
    tpu.vector_store %arg5[%c0_59, %c0_60, %c304], %85 {strides = array<i32>} : memref<1x8x468xbf16, #tpu.memory_space<vmem>>, vector<1x4x16xbf16>,
    %c0_61 = arith.constant 0 : index
    %c0_62 = arith.constant 0 : index
    %c224_63 = arith.constant 224 : index
    %86 = vector.load %arg1[%c0_61, %c0_62, %c224_63] : memref<1x4x256xf32, #tpu.memory_space<vmem>>, vector<1x4x16xf32>
    %87 = vector.shape_cast %86 : vector<1x4x16xf32> to vector<4x16xf32>
    %88 = arith.truncf %87 : vector<4x16xf32> to vector<4x16xbf16>
    %c0_64 = arith.constant 0 : index
    %c0_65 = arith.constant 0 : index
    %c324 = arith.constant 324 : index
    %89 = vector.load %arg5[%c0_64, %c0_65, %c324] : memref<1x8x468xbf16, #tpu.memory_space<vmem>>, vector<1x4x16xbf16>
    %90 = vector.shape_cast %89 : vector<1x4x16xbf16> to vector<4x16xbf16>
    %91 = vector.shape_cast %88 : vector<4x16xbf16> to vector<1x4x16xbf16>
    tpu.vector_store %arg5[%c0_64, %c0_65, %c324], %91 {strides = array<i32>} : memref<1x8x468xbf16, #tpu.memory_space<vmem>>, vector<1x4x16xbf16>,
    %c0_66 = arith.constant 0 : index
    %c0_67 = arith.constant 0 : index
    %c240 = arith.constant 240 : index
    %92 = vector.load %arg1[%c0_66, %c0_67, %c240] : memref<1x4x256xf32, #tpu.memory_space<vmem>>, vector<1x4x16xf32>
    %93 = vector.shape_cast %92 : vector<1x4x16xf32> to vector<4x16xf32>
    %94 = arith.truncf %93 : vector<4x16xf32> to vector<4x16xbf16>
    %c0_68 = arith.constant 0 : index
    %c0_69 = arith.constant 0 : index
    %c344 = arith.constant 344 : index
    %95 = vector.load %arg5[%c0_68, %c0_69, %c344] : memref<1x8x468xbf16, #tpu.memory_space<vmem>>, vector<1x4x16xbf16>
    %96 = vector.shape_cast %95 : vector<1x4x16xbf16> to vector<4x16xbf16>
    %97 = vector.shape_cast %94 : vector<4x16xbf16> to vector<1x4x16xbf16>
    tpu.vector_store %arg5[%c0_68, %c0_69, %c344], %97 {strides = array<i32>} : memref<1x8x468xbf16, #tpu.memory_space<vmem>>, vector<1x4x16xbf16>,
    %c0_70 = arith.constant 0 : index
    %c0_71 = arith.constant 0 : index
    %c21 = arith.constant 21 : index
    %98 = vector.load %arg5[%c0_70, %c0_71, %c21] : memref<1x8x468xbf16, #tpu.memory_space<vmem>>, vector<1x8x384xbf16>
    %99 = vector.shape_cast %98 : vector<1x8x384xbf16> to vector<8x384xbf16>
    %c0_72 = arith.constant 0 : index
    %c0_73 = arith.constant 0 : index
    %100 = vector.load %arg6[%c0_72, %c0_73] : memref<144x384xbf16, #tpu.memory_space<vmem>>, vector<8x384xbf16>
    tpu.vector_store %arg6[%c0_72, %c0_73], %99 {strides = array<i32>} : memref<144x384xbf16, #tpu.memory_space<vmem>>, vector<8x384xbf16>,
    %c0_74 = arith.constant 0 : index
    %c0_75 = arith.constant 0 : index
    %c22 = arith.constant 22 : index
    %101 = vector.load %arg5[%c0_74, %c0_75, %c22] : memref<1x8x468xbf16, #tpu.memory_space<vmem>>, vector<1x8x384xbf16>
    %102 = vector.shape_cast %101 : vector<1x8x384xbf16> to vector<8x384xbf16>
    %c8 = arith.constant 8 : index
    %c0_76 = arith.constant 0 : index
    %103 = vector.load %arg6[%c8, %c0_76] : memref<144x384xbf16, #tpu.memory_space<vmem>>, vector<8x384xbf16>
    tpu.vector_store %arg6[%c8, %c0_76], %102 {strides = array<i32>} : memref<144x384xbf16, #tpu.memory_space<vmem>>, vector<8x384xbf16>,
    %c0_77 = arith.constant 0 : index
    %c0_78 = arith.constant 0 : index
    %c23 = arith.constant 23 : index
    %104 = vector.load %arg5[%c0_77, %c0_78, %c23] : memref<1x8x468xbf16, #tpu.memory_space<vmem>>, vector<1x8x384xbf16>
    %105 = vector.shape_cast %104 : vector<1x8x384xbf16> to vector<8x384xbf16>
    %c16_79 = arith.constant 16 : index
    %c0_80 = arith.constant 0 : index
    %106 = vector.load %arg6[%c16_79, %c0_80] : memref<144x384xbf16, #tpu.memory_space<vmem>>, vector<8x384xbf16>
    tpu.vector_store %arg6[%c16_79, %c0_80], %105 {strides = array<i32>} : memref<144x384xbf16, #tpu.memory_space<vmem>>, vector<8x384xbf16>,
    %c0_81 = arith.constant 0 : index
    %c0_82 = arith.constant 0 : index
    %c41 = arith.constant 41 : index
    %107 = vector.load %arg5[%c0_81, %c0_82, %c41] : memref<1x8x468xbf16, #tpu.memory_space<vmem>>, vector<1x8x384xbf16>
    %108 = vector.shape_cast %107 : vector<1x8x384xbf16> to vector<8x384xbf16>
    %c24 = arith.constant 24 : index
    %c0_83 = arith.constant 0 : index
    %109 = vector.load %arg6[%c24, %c0_83] : memref<144x384xbf16, #tpu.memory_space<vmem>>, vector<8x384xbf16>
    tpu.vector_store %arg6[%c24, %c0_83], %108 {strides = array<i32>} : memref<144x384xbf16, #tpu.memory_space<vmem>>, vector<8x384xbf16>,
    %c0_84 = arith.constant 0 : index
    %c0_85 = arith.constant 0 : index
    %c42 = arith.constant 42 : index
    %110 = vector.load %arg5[%c0_84, %c0_85, %c42] : memref<1x8x468xbf16, #tpu.memory_space<vmem>>, vector<1x8x384xbf16>
    %111 = vector.shape_cast %110 : vector<1x8x384xbf16> to vector<8x384xbf16>
    %c32_86 = arith.constant 32 : index
    %c0_87 = arith.constant 0 : index
    %112 = vector.load %arg6[%c32_86, %c0_87] : memref<144x384xbf16, #tpu.memory_space<vmem>>, vector<8x384xbf16>
    tpu.vector_store %arg6[%c32_86, %c0_87], %111 {strides = array<i32>} : memref<144x384xbf16, #tpu.memory_space<vmem>>, vector<8x384xbf16>,
    %c0_88 = arith.constant 0 : index
    %c0_89 = arith.constant 0 : index
    %c43 = arith.constant 43 : index
    %113 = vector.load %arg5[%c0_88, %c0_89, %c43] : memref<1x8x468xbf16, #tpu.memory_space<vmem>>, vector<1x8x384xbf16>
    %114 = vector.shape_cast %113 : vector<1x8x384xbf16> to vector<8x384xbf16>
    %c40 = arith.constant 40 : index
    %c0_90 = arith.constant 0 : index
    %115 = vector.load %arg6[%c40, %c0_90] : memref<144x384xbf16, #tpu.memory_space<vmem>>, vector<8x384xbf16>
    tpu.vector_store %arg6[%c40, %c0_90], %114 {strides = array<i32>} : memref<144x384xbf16, #tpu.memory_space<vmem>>, vector<8x384xbf16>,
    %c0_91 = arith.constant 0 : index
    %c0_92 = arith.constant 0 : index
    %c61 = arith.constant 61 : index
    %116 = vector.load %arg5[%c0_91, %c0_92, %c61] : memref<1x8x468xbf16, #tpu.memory_space<vmem>>, vector<1x8x384xbf16>
    %117 = vector.shape_cast %116 : vector<1x8x384xbf16> to vector<8x384xbf16>
    %c48_93 = arith.constant 48 : index
    %c0_94 = arith.constant 0 : index
    %118 = vector.load %arg6[%c48_93, %c0_94] : memref<144x384xbf16, #tpu.memory_space<vmem>>, vector<8x384xbf16>
    tpu.vector_store %arg6[%c48_93, %c0_94], %117 {strides = array<i32>} : memref<144x384xbf16, #tpu.memory_space<vmem>>, vector<8x384xbf16>,
    %c0_95 = arith.constant 0 : index
    %c0_96 = arith.constant 0 : index
    %c62 = arith.constant 62 : index
    %119 = vector.load %arg5[%c0_95, %c0_96, %c62] : memref<1x8x468xbf16, #tpu.memory_space<vmem>>, vector<1x8x384xbf16>
    %120 = vector.shape_cast %119 : vector<1x8x384xbf16> to vector<8x384xbf16>
    %c56 = arith.constant 56 : index
    %c0_97 = arith.constant 0 : index
    %121 = vector.load %arg6[%c56, %c0_97] : memref<144x384xbf16, #tpu.memory_space<vmem>>, vector<8x384xbf16>
    tpu.vector_store %arg6[%c56, %c0_97], %120 {strides = array<i32>} : memref<144x384xbf16, #tpu.memory_space<vmem>>, vector<8x384xbf16>,
    %c0_98 = arith.constant 0 : index
    %c0_99 = arith.constant 0 : index
    %c63 = arith.constant 63 : index
    %122 = vector.load %arg5[%c0_98, %c0_99, %c63] : memref<1x8x468xbf16, #tpu.memory_space<vmem>>, vector<1x8x384xbf16>
    %123 = vector.shape_cast %122 : vector<1x8x384xbf16> to vector<8x384xbf16>
    %c64_100 = arith.constant 64 : index
    %c0_101 = arith.constant 0 : index
    %124 = vector.load %arg6[%c64_100, %c0_101] : memref<144x384xbf16, #tpu.memory_space<vmem>>, vector<8x384xbf16>
    tpu.vector_store %arg6[%c64_100, %c0_101], %123 {strides = array<i32>} : memref<144x384xbf16, #tpu.memory_space<vmem>>, vector<8x384xbf16>,
    %c0_102 = arith.constant 0 : index
    %c0_103 = arith.constant 0 : index
    %c0_104 = arith.constant 0 : index
    %125 = vector.load %arg5[%c0_102, %c0_103, %c0_104] : memref<1x8x468xbf16, #tpu.memory_space<vmem>>, vector<1x8x384xbf16>
    %126 = vector.shape_cast %125 : vector<1x8x384xbf16> to vector<8x384xbf16>
    %c72 = arith.constant 72 : index
    %c0_105 = arith.constant 0 : index
    %127 = vector.load %arg6[%c72, %c0_105] : memref<144x384xbf16, #tpu.memory_space<vmem>>, vector<8x384xbf16>
    tpu.vector_store %arg6[%c72, %c0_105], %126 {strides = array<i32>} : memref<144x384xbf16, #tpu.memory_space<vmem>>, vector<8x384xbf16>,
    %c0_106 = arith.constant 0 : index
    %c0_107 = arith.constant 0 : index
    %c2 = arith.constant 2 : index
    %128 = vector.load %arg5[%c0_106, %c0_107, %c2] : memref<1x8x468xbf16, #tpu.memory_space<vmem>>, vector<1x8x384xbf16>
    %129 = vector.shape_cast %128 : vector<1x8x384xbf16> to vector<8x384xbf16>
    %c80_108 = arith.constant 80 : index
    %c0_109 = arith.constant 0 : index
    %130 = vector.load %arg6[%c80_108, %c0_109] : memref<144x384xbf16, #tpu.memory_space<vmem>>, vector<8x384xbf16>
    tpu.vector_store %arg6[%c80_108, %c0_109], %129 {strides = array<i32>} : memref<144x384xbf16, #tpu.memory_space<vmem>>, vector<8x384xbf16>,
    %c0_110 = arith.constant 0 : index
    %c0_111 = arith.constant 0 : index
    %c4 = arith.constant 4 : index
    %131 = vector.load %arg5[%c0_110, %c0_111, %c4] : memref<1x8x468xbf16, #tpu.memory_space<vmem>>, vector<1x8x384xbf16>
    %132 = vector.shape_cast %131 : vector<1x8x384xbf16> to vector<8x384xbf16>
    %c88 = arith.constant 88 : index
    %c0_112 = arith.constant 0 : index
    %133 = vector.load %arg6[%c88, %c0_112] : memref<144x384xbf16, #tpu.memory_space<vmem>>, vector<8x384xbf16>
    tpu.vector_store %arg6[%c88, %c0_112], %132 {strides = array<i32>} : memref<144x384xbf16, #tpu.memory_space<vmem>>, vector<8x384xbf16>,
    %c0_113 = arith.constant 0 : index
    %c0_114 = arith.constant 0 : index
    %c40_115 = arith.constant 40 : index
    %134 = vector.load %arg5[%c0_113, %c0_114, %c40_115] : memref<1x8x468xbf16, #tpu.memory_space<vmem>>, vector<1x8x384xbf16>
    %135 = vector.shape_cast %134 : vector<1x8x384xbf16> to vector<8x384xbf16>
    %c96_116 = arith.constant 96 : index
    %c0_117 = arith.constant 0 : index
    %136 = vector.load %arg6[%c96_116, %c0_117] : memref<144x384xbf16, #tpu.memory_space<vmem>>, vector<8x384xbf16>
    tpu.vector_store %arg6[%c96_116, %c0_117], %135 {strides = array<i32>} : memref<144x384xbf16, #tpu.memory_space<vmem>>, vector<8x384xbf16>,
    %c0_118 = arith.constant 0 : index
    %c0_119 = arith.constant 0 : index
    %c42_120 = arith.constant 42 : index
    %137 = vector.load %arg5[%c0_118, %c0_119, %c42_120] : memref<1x8x468xbf16, #tpu.memory_space<vmem>>, vector<1x8x384xbf16>
    %138 = vector.shape_cast %137 : vector<1x8x384xbf16> to vector<8x384xbf16>
    %c104_121 = arith.constant 104 : index
    %c0_122 = arith.constant 0 : index
    %139 = vector.load %arg6[%c104_121, %c0_122] : memref<144x384xbf16, #tpu.memory_space<vmem>>, vector<8x384xbf16>
    tpu.vector_store %arg6[%c104_121, %c0_122], %138 {strides = array<i32>} : memref<144x384xbf16, #tpu.memory_space<vmem>>, vector<8x384xbf16>,
    %c0_123 = arith.constant 0 : index
    %c0_124 = arith.constant 0 : index
    %c44_125 = arith.constant 44 : index
    %140 = vector.load %arg5[%c0_123, %c0_124, %c44_125] : memref<1x8x468xbf16, #tpu.memory_space<vmem>>, vector<1x8x384xbf16>
    %141 = vector.shape_cast %140 : vector<1x8x384xbf16> to vector<8x384xbf16>
    %c112_126 = arith.constant 112 : index
    %c0_127 = arith.constant 0 : index
    %142 = vector.load %arg6[%c112_126, %c0_127] : memref<144x384xbf16, #tpu.memory_space<vmem>>, vector<8x384xbf16>
    tpu.vector_store %arg6[%c112_126, %c0_127], %141 {strides = array<i32>} : memref<144x384xbf16, #tpu.memory_space<vmem>>, vector<8x384xbf16>,
    %c0_128 = arith.constant 0 : index
    %c0_129 = arith.constant 0 : index
    %c80_130 = arith.constant 80 : index
    %143 = vector.load %arg5[%c0_128, %c0_129, %c80_130] : memref<1x8x468xbf16, #tpu.memory_space<vmem>>, vector<1x8x384xbf16>
    %144 = vector.shape_cast %143 : vector<1x8x384xbf16> to vector<8x384xbf16>
    %c120 = arith.constant 120 : index
    %c0_131 = arith.constant 0 : index
    %145 = vector.load %arg6[%c120, %c0_131] : memref<144x384xbf16, #tpu.memory_space<vmem>>, vector<8x384xbf16>
    tpu.vector_store %arg6[%c120, %c0_131], %144 {strides = array<i32>} : memref<144x384xbf16, #tpu.memory_space<vmem>>, vector<8x384xbf16>,
    %c0_132 = arith.constant 0 : index
    %c0_133 = arith.constant 0 : index
    %c82 = arith.constant 82 : index
    %146 = vector.load %arg5[%c0_132, %c0_133, %c82] : memref<1x8x468xbf16, #tpu.memory_space<vmem>>, vector<1x8x384xbf16>
    %147 = vector.shape_cast %146 : vector<1x8x384xbf16> to vector<8x384xbf16>
    %c128_134 = arith.constant 128 : index
    %c0_135 = arith.constant 0 : index
    %148 = vector.load %arg6[%c128_134, %c0_135] : memref<144x384xbf16, #tpu.memory_space<vmem>>, vector<8x384xbf16>
    tpu.vector_store %arg6[%c128_134, %c0_135], %147 {strides = array<i32>} : memref<144x384xbf16, #tpu.memory_space<vmem>>, vector<8x384xbf16>,
    %c0_136 = arith.constant 0 : index
    %c0_137 = arith.constant 0 : index
    %c84_138 = arith.constant 84 : index
    %149 = vector.load %arg5[%c0_136, %c0_137, %c84_138] : memref<1x8x468xbf16, #tpu.memory_space<vmem>>, vector<1x8x384xbf16>
    %150 = vector.shape_cast %149 : vector<1x8x384xbf16> to vector<8x384xbf16>
    %c136 = arith.constant 136 : index
    %c0_139 = arith.constant 0 : index
    %151 = vector.load %arg6[%c136, %c0_139] : memref<144x384xbf16, #tpu.memory_space<vmem>>, vector<8x384xbf16>
    tpu.vector_store %arg6[%c136, %c0_139], %150 {strides = array<i32>} : memref<144x384xbf16, #tpu.memory_space<vmem>>, vector<8x384xbf16>,
    %c0_140 = arith.constant 0 : index
    %c0_141 = arith.constant 0 : index
    %152 = vector.load %arg2[%c0_140, %c0_141] : memref<8x144xbf16, #tpu.memory_space<vmem>>, vector<8x144xbf16>
    %c0_142 = arith.constant 0 : index
    %c0_143 = arith.constant 0 : index
    %153 = vector.load %arg6[%c0_142, %c0_143] : memref<144x384xbf16, #tpu.memory_space<vmem>>, vector<144x384xbf16>
    %cst_144 = arith.constant dense<0.000000e+00> : vector<8x384xf32>
    %154 = tpu.matmul %152, %153, %cst_144 {dimension_numbers = #tpu.dot_dimension_numbers<[1], [0], [0], [1], [0, 0, 1, 1], [], []>} : vector<8x144xbf16>, vector<144x384xbf16>, vector<8x384xf32> -> vector<8x384xf32>
    %c0_145 = arith.constant 0 : index
    %c0_146 = arith.constant 0 : index
    %155 = vector.load %arg3[%c0_145, %c0_146] : memref<8x1xf32, #tpu.memory_space<vmem>>, vector<8x1xf32>
    %156 = vector.broadcast %155 : vector<8x1xf32> to vector<8x384xf32>
    %157 = arith.addf %154, %156 : vector<8x384xf32>
    %158 = vector.extract_strided_slice %157 {offsets = [0, 2], sizes = [8, 16], strides = [1, 1]} : vector<8x384xf32> to vector<8x16xf32>
    %c0_147 = arith.constant 0 : index
    %c0_148 = arith.constant 0 : index
    %c0_149 = arith.constant 0 : index
    %159 = vector.load %arg4[%c0_147, %c0_148, %c0_149] : memref<1x8x256xf32, #tpu.memory_space<vmem>>, vector<1x8x16xf32>
    %160 = vector.shape_cast %159 : vector<1x8x16xf32> to vector<8x16xf32>
    %161 = vector.shape_cast %158 : vector<8x16xf32> to vector<1x8x16xf32>
    tpu.vector_store %arg4[%c0_147, %c0_148, %c0_149], %161 {strides = array<i32>} : memref<1x8x256xf32, #tpu.memory_space<vmem>>, vector<1x8x16xf32>,
    %162 = vector.extract_strided_slice %157 {offsets = [0, 22], sizes = [8, 16], strides = [1, 1]} : vector<8x384xf32> to vector<8x16xf32>
    %c0_150 = arith.constant 0 : index
    %c0_151 = arith.constant 0 : index
    %c16_152 = arith.constant 16 : index
    %163 = vector.load %arg4[%c0_150, %c0_151, %c16_152] : memref<1x8x256xf32, #tpu.memory_space<vmem>>, vector<1x8x16xf32>
    %164 = vector.shape_cast %163 : vector<1x8x16xf32> to vector<8x16xf32>
    %165 = vector.shape_cast %162 : vector<8x16xf32> to vector<1x8x16xf32>
    tpu.vector_store %arg4[%c0_150, %c0_151, %c16_152], %165 {strides = array<i32>} : memref<1x8x256xf32, #tpu.memory_space<vmem>>, vector<1x8x16xf32>,
    %166 = vector.extract_strided_slice %157 {offsets = [0, 42], sizes = [8, 16], strides = [1, 1]} : vector<8x384xf32> to vector<8x16xf32>
    %c0_153 = arith.constant 0 : index
    %c0_154 = arith.constant 0 : index
    %c32_155 = arith.constant 32 : index
    %167 = vector.load %arg4[%c0_153, %c0_154, %c32_155] : memref<1x8x256xf32, #tpu.memory_space<vmem>>, vector<1x8x16xf32>
    %168 = vector.shape_cast %167 : vector<1x8x16xf32> to vector<8x16xf32>
    %169 = vector.shape_cast %166 : vector<8x16xf32> to vector<1x8x16xf32>
    tpu.vector_store %arg4[%c0_153, %c0_154, %c32_155], %169 {strides = array<i32>} : memref<1x8x256xf32, #tpu.memory_space<vmem>>, vector<1x8x16xf32>,
    %170 = vector.extract_strided_slice %157 {offsets = [0, 62], sizes = [8, 16], strides = [1, 1]} : vector<8x384xf32> to vector<8x16xf32>
    %c0_156 = arith.constant 0 : index
    %c0_157 = arith.constant 0 : index
    %c48_158 = arith.constant 48 : index
    %171 = vector.load %arg4[%c0_156, %c0_157, %c48_158] : memref<1x8x256xf32, #tpu.memory_space<vmem>>, vector<1x8x16xf32>
    %172 = vector.shape_cast %171 : vector<1x8x16xf32> to vector<8x16xf32>
    %173 = vector.shape_cast %170 : vector<8x16xf32> to vector<1x8x16xf32>
    tpu.vector_store %arg4[%c0_156, %c0_157, %c48_158], %173 {strides = array<i32>} : memref<1x8x256xf32, #tpu.memory_space<vmem>>, vector<1x8x16xf32>,
    %174 = vector.extract_strided_slice %157 {offsets = [0, 82], sizes = [8, 16], strides = [1, 1]} : vector<8x384xf32> to vector<8x16xf32>
    %c0_159 = arith.constant 0 : index
    %c0_160 = arith.constant 0 : index
    %c64_161 = arith.constant 64 : index
    %175 = vector.load %arg4[%c0_159, %c0_160, %c64_161] : memref<1x8x256xf32, #tpu.memory_space<vmem>>, vector<1x8x16xf32>
    %176 = vector.shape_cast %175 : vector<1x8x16xf32> to vector<8x16xf32>
    %177 = vector.shape_cast %174 : vector<8x16xf32> to vector<1x8x16xf32>
    tpu.vector_store %arg4[%c0_159, %c0_160, %c64_161], %177 {strides = array<i32>} : memref<1x8x256xf32, #tpu.memory_space<vmem>>, vector<1x8x16xf32>,
    %178 = vector.extract_strided_slice %157 {offsets = [0, 102], sizes = [8, 16], strides = [1, 1]} : vector<8x384xf32> to vector<8x16xf32>
    %c0_162 = arith.constant 0 : index
    %c0_163 = arith.constant 0 : index
    %c80_164 = arith.constant 80 : index
    %179 = vector.load %arg4[%c0_162, %c0_163, %c80_164] : memref<1x8x256xf32, #tpu.memory_space<vmem>>, vector<1x8x16xf32>
    %180 = vector.shape_cast %179 : vector<1x8x16xf32> to vector<8x16xf32>
    %181 = vector.shape_cast %178 : vector<8x16xf32> to vector<1x8x16xf32>
    tpu.vector_store %arg4[%c0_162, %c0_163, %c80_164], %181 {strides = array<i32>} : memref<1x8x256xf32, #tpu.memory_space<vmem>>, vector<1x8x16xf32>,
    %182 = vector.extract_strided_slice %157 {offsets = [0, 122], sizes = [8, 16], strides = [1, 1]} : vector<8x384xf32> to vector<8x16xf32>
    %c0_165 = arith.constant 0 : index
    %c0_166 = arith.constant 0 : index
    %c96_167 = arith.constant 96 : index
    %183 = vector.load %arg4[%c0_165, %c0_166, %c96_167] : memref<1x8x256xf32, #tpu.memory_space<vmem>>, vector<1x8x16xf32>
    %184 = vector.shape_cast %183 : vector<1x8x16xf32> to vector<8x16xf32>
    %185 = vector.shape_cast %182 : vector<8x16xf32> to vector<1x8x16xf32>
    tpu.vector_store %arg4[%c0_165, %c0_166, %c96_167], %185 {strides = array<i32>} : memref<1x8x256xf32, #tpu.memory_space<vmem>>, vector<1x8x16xf32>,
    %186 = vector.extract_strided_slice %157 {offsets = [0, 142], sizes = [8, 16], strides = [1, 1]} : vector<8x384xf32> to vector<8x16xf32>
    %c0_168 = arith.constant 0 : index
    %c0_169 = arith.constant 0 : index
    %c112_170 = arith.constant 112 : index
    %187 = vector.load %arg4[%c0_168, %c0_169, %c112_170] : memref<1x8x256xf32, #tpu.memory_space<vmem>>, vector<1x8x16xf32>
    %188 = vector.shape_cast %187 : vector<1x8x16xf32> to vector<8x16xf32>
    %189 = vector.shape_cast %186 : vector<8x16xf32> to vector<1x8x16xf32>
    tpu.vector_store %arg4[%c0_168, %c0_169, %c112_170], %189 {strides = array<i32>} : memref<1x8x256xf32, #tpu.memory_space<vmem>>, vector<1x8x16xf32>,
    %190 = vector.extract_strided_slice %157 {offsets = [0, 162], sizes = [8, 16], strides = [1, 1]} : vector<8x384xf32> to vector<8x16xf32>
    %c0_171 = arith.constant 0 : index
    %c0_172 = arith.constant 0 : index
    %c128_173 = arith.constant 128 : index
    %191 = vector.load %arg4[%c0_171, %c0_172, %c128_173] : memref<1x8x256xf32, #tpu.memory_space<vmem>>, vector<1x8x16xf32>
    %192 = vector.shape_cast %191 : vector<1x8x16xf32> to vector<8x16xf32>
    %193 = vector.shape_cast %190 : vector<8x16xf32> to vector<1x8x16xf32>
    tpu.vector_store %arg4[%c0_171, %c0_172, %c128_173], %193 {strides = array<i32>} : memref<1x8x256xf32, #tpu.memory_space<vmem>>, vector<1x8x16xf32>,
    %194 = vector.extract_strided_slice %157 {offsets = [0, 182], sizes = [8, 16], strides = [1, 1]} : vector<8x384xf32> to vector<8x16xf32>
    %c0_174 = arith.constant 0 : index
    %c0_175 = arith.constant 0 : index
    %c144_176 = arith.constant 144 : index
    %195 = vector.load %arg4[%c0_174, %c0_175, %c144_176] : memref<1x8x256xf32, #tpu.memory_space<vmem>>, vector<1x8x16xf32>
    %196 = vector.shape_cast %195 : vector<1x8x16xf32> to vector<8x16xf32>
    %197 = vector.shape_cast %194 : vector<8x16xf32> to vector<1x8x16xf32>
    tpu.vector_store %arg4[%c0_174, %c0_175, %c144_176], %197 {strides = array<i32>} : memref<1x8x256xf32, #tpu.memory_space<vmem>>, vector<1x8x16xf32>,
    %198 = vector.extract_strided_slice %157 {offsets = [0, 202], sizes = [8, 16], strides = [1, 1]} : vector<8x384xf32> to vector<8x16xf32>
    %c0_177 = arith.constant 0 : index
    %c0_178 = arith.constant 0 : index
    %c160_179 = arith.constant 160 : index
    %199 = vector.load %arg4[%c0_177, %c0_178, %c160_179] : memref<1x8x256xf32, #tpu.memory_space<vmem>>, vector<1x8x16xf32>
    %200 = vector.shape_cast %199 : vector<1x8x16xf32> to vector<8x16xf32>
    %201 = vector.shape_cast %198 : vector<8x16xf32> to vector<1x8x16xf32>
    tpu.vector_store %arg4[%c0_177, %c0_178, %c160_179], %201 {strides = array<i32>} : memref<1x8x256xf32, #tpu.memory_space<vmem>>, vector<1x8x16xf32>,
    %202 = vector.extract_strided_slice %157 {offsets = [0, 222], sizes = [8, 16], strides = [1, 1]} : vector<8x384xf32> to vector<8x16xf32>
    %c0_180 = arith.constant 0 : index
    %c0_181 = arith.constant 0 : index
    %c176_182 = arith.constant 176 : index
    %203 = vector.load %arg4[%c0_180, %c0_181, %c176_182] : memref<1x8x256xf32, #tpu.memory_space<vmem>>, vector<1x8x16xf32>
    %204 = vector.shape_cast %203 : vector<1x8x16xf32> to vector<8x16xf32>
    %205 = vector.shape_cast %202 : vector<8x16xf32> to vector<1x8x16xf32>
    tpu.vector_store %arg4[%c0_180, %c0_181, %c176_182], %205 {strides = array<i32>} : memref<1x8x256xf32, #tpu.memory_space<vmem>>, vector<1x8x16xf32>,
    %206 = vector.extract_strided_slice %157 {offsets = [0, 242], sizes = [8, 16], strides = [1, 1]} : vector<8x384xf32> to vector<8x16xf32>
    %c0_183 = arith.constant 0 : index
    %c0_184 = arith.constant 0 : index
    %c192_185 = arith.constant 192 : index
    %207 = vector.load %arg4[%c0_183, %c0_184, %c192_185] : memref<1x8x256xf32, #tpu.memory_space<vmem>>, vector<1x8x16xf32>
    %208 = vector.shape_cast %207 : vector<1x8x16xf32> to vector<8x16xf32>
    %209 = vector.shape_cast %206 : vector<8x16xf32> to vector<1x8x16xf32>
    tpu.vector_store %arg4[%c0_183, %c0_184, %c192_185], %209 {strides = array<i32>} : memref<1x8x256xf32, #tpu.memory_space<vmem>>, vector<1x8x16xf32>,
    %210 = vector.extract_strided_slice %157 {offsets = [0, 262], sizes = [8, 16], strides = [1, 1]} : vector<8x384xf32> to vector<8x16xf32>
    %c0_186 = arith.constant 0 : index
    %c0_187 = arith.constant 0 : index
    %c208_188 = arith.constant 208 : index
    %211 = vector.load %arg4[%c0_186, %c0_187, %c208_188] : memref<1x8x256xf32, #tpu.memory_space<vmem>>, vector<1x8x16xf32>
    %212 = vector.shape_cast %211 : vector<1x8x16xf32> to vector<8x16xf32>
    %213 = vector.shape_cast %210 : vector<8x16xf32> to vector<1x8x16xf32>
    tpu.vector_store %arg4[%c0_186, %c0_187, %c208_188], %213 {strides = array<i32>} : memref<1x8x256xf32, #tpu.memory_space<vmem>>, vector<1x8x16xf32>,
    %214 = vector.extract_strided_slice %157 {offsets = [0, 282], sizes = [8, 16], strides = [1, 1]} : vector<8x384xf32> to vector<8x16xf32>
    %c0_189 = arith.constant 0 : index
    %c0_190 = arith.constant 0 : index
    %c224_191 = arith.constant 224 : index
    %215 = vector.load %arg4[%c0_189, %c0_190, %c224_191] : memref<1x8x256xf32, #tpu.memory_space<vmem>>, vector<1x8x16xf32>
    %216 = vector.shape_cast %215 : vector<1x8x16xf32> to vector<8x16xf32>
    %217 = vector.shape_cast %214 : vector<8x16xf32> to vector<1x8x16xf32>
    tpu.vector_store %arg4[%c0_189, %c0_190, %c224_191], %217 {strides = array<i32>} : memref<1x8x256xf32, #tpu.memory_space<vmem>>, vector<1x8x16xf32>,
    %218 = vector.extract_strided_slice %157 {offsets = [0, 302], sizes = [8, 16], strides = [1, 1]} : vector<8x384xf32> to vector<8x16xf32>
    %c0_192 = arith.constant 0 : index
    %c0_193 = arith.constant 0 : index
    %c240_194 = arith.constant 240 : index
    %219 = vector.load %arg4[%c0_192, %c0_193, %c240_194] : memref<1x8x256xf32, #tpu.memory_space<vmem>>, vector<1x8x16xf32>
    %220 = vector.shape_cast %219 : vector<1x8x16xf32> to vector<8x16xf32>
    %221 = vector.shape_cast %218 : vector<8x16xf32> to vector<1x8x16xf32>
    tpu.vector_store %arg4[%c0_192, %c0_193, %c240_194], %221 {strides = array<i32>} : memref<1x8x256xf32, #tpu.memory_space<vmem>>, vector<1x8x16xf32>,
    return
  }
  func.func @transform_0(%arg0: i32) -> (i32, i32, i32) {
    %c0_i32 = arith.constant 0 : i32
    %c0_i32_0 = arith.constant 0 : i32
    %c0_i32_1 = arith.constant 0 : i32
    return %arg0, %c0_i32, %c0_i32_0 : i32, i32, i32
  }
  func.func @transform_1(%arg0: i32) -> (i32, i32) {
    %c0_i32 = arith.constant 0 : i32
    %c0_i32_0 = arith.constant 0 : i32
    %c0_i32_1 = arith.constant 0 : i32
    return %c0_i32, %c0_i32_0 : i32, i32
  }
  func.func @transform_2(%arg0: i32) -> (i32, i32) {
    %c0_i32 = arith.constant 0 : i32
    %c0_i32_0 = arith.constant 0 : i32
    %c0_i32_1 = arith.constant 0 : i32
    return %c0_i32, %c0_i32_0 : i32, i32
  }
  func.func @transform_3(%arg0: i32) -> (i32, i32, i32) {
    %c0_i32 = arith.constant 0 : i32
    %c0_i32_0 = arith.constant 0 : i32
    %c0_i32_1 = arith.constant 0 : i32
    return %arg0, %c0_i32, %c0_i32_0 : i32, i32, i32
  }
}

</mosaic_0001>

<bundles_post_ra>
// kernel: stacked_atrous_convs.1
= control target key start
LH: loop header
LB: loop body
LE: loop exit
PB: predicated region body
PF: predicated region fallthrough
CT: control target
= control target key end

     0   :  { %s1277_s12 = smov 0   ;;  %s1444_s0 = inlined_call_operand.vmem [shape: f32[2,4,256], index: 0, kind: input, shape index: {}]   ;;  %s1445_s1 = inlined_call_operand.vmem [shape: bf16[8,144], index: 1, kind: input, shape index: {}]   ;;  %s1446_s2 = inlined_call_operand.vmem [shape: f32[8,1], index: 2, kind: input, shape index: {}]   ;;  %s1447_s3 = inlined_call_operand.vmem [shape: f32[2,8,256], index: 3, kind: output, shape index: {}]  }
   0x1 LB: > { %s1071_s13 = sadd.s32 4294967295, %s1214_s12   ;;  %p1075_p0 = scmp.ge.s32.totalorder %s1214_s12, 1  ;;  %s1214_s12 = sphi %s1277_s12, %s13_s12  }
   0x2   : > { %p137_p1 = scmp.lt.s32.totalorder %s1214_s12, 3 }
   0x4   : > { %p138_p2 = pnand %p1075_p0, %p137_p1 }
   0x5   : > { %p161_p3 = scmp.lt.s32.totalorder (!%p138_p2), %s1071_s13, 1  ;;  %s1217_s18 = smov (!%p138_p2), 60  }
   0x6   : > { %141 = sbr.rel (%p138_p2) target bundleno = 711 (0x2c7), region = 32  ;;  %s1218_s19 = smov (!%p138_p2), 44  }
   0x7   : > { %s1219_s20 = smov (!%p138_p2), 48   ;;  %s1220_s21 = smov (!%p138_p2), 52  }
   0x8   : > { %s1221_s22 = smov (!%p138_p2), 56   ;;  %s1222_s23 = smov (!%p138_p2), 64  }
   0x9   : > { %s1223_s24 = smov (!%p138_p2), 68   ;;  %s1224_s25 = smov (!%p138_p2), 72  }
   0xa   : > { %s1225_s26 = smov (!%p138_p2), 84   ;;  %s1226_s27 = smov (!%p138_p2), 76  }
   0xb   : > { %v1216_v0 = vmov 0   ;;  %s1449_s13 = smov (!%p161_p3, %s1071_s13), 1  ;;  %vm173_vm0 = vcmask 1043456   ;;  %vm174_vm1 = vcmask 687108   ;;  %s1227_s28 = smov 80   ;;  %vm185_vm3 = vcmask 484704  }
   0xc   : > { %172 = vst [vmem:[#allocation2] sm:$0xff] %v1216_v0  ;;  %894 = vmatprep.subr.bf16.mxu1 %v1216_v0  ;;  %1196 = vset.pattern.permute.xlu0 %v1216_v0  ;;  %s1129_s14 = sshll.u32 %s1449_s13, 3  ;;  %vm175_vm2 = vmor %vm174_vm1, %vm173_vm0  ;;  %s1228_s29 = smov 88   ;;  %vm195_vm4 = vcmask 648704   ;;  %vm205_vm5 = vcmask 812704   ;;  %vm228_vm6 = vcmask 1042400  }
   0xd   : > { %s1294_s17 = scalar_lea.vmem %s1444_s0, %s1129_s14  ;;  %176 = vst.msk [vmem:[#allocation2 + $0x8] sm:$0xff] %vm175_vm2, %v1216_v0  ;;  %s1229_s30 = smov 92   ;;  %vm229_vm7 = vcmask 95236   ;;  %vm225_vm8 = vcmask 490496   ;;  %vm215_vm9 = vcmask 976704   ;;  %vm240_vm11 = vcmask 255104  }
   0xe   : > { %v217_v1 = vld [vmem:[%s1294_s17] sm:$0xf]  ;;  %v282_v17 = vld [vmem:[%s1294_s17 + $0x4] sm:$0xf]  ;;  %s1230_s4 = smov 96   ;;  %s1231_s5 = smov 100   ;;  %vm230_vm10 = vmor %vm229_vm7, %vm228_vm6 }
   0xf   : > { %v177_v2 = vld [vmem:[%s1294_s17] sm:$0xf]  ;;  %v1135_v4 = vpack.c.bf16 %v217_v1, %v217_v1  ;;  %v262_v18 = vld [vmem:[%s1294_s17 + $0x4] sm:$0xf]  ;;  %v1141_v19 = vpack.c.bf16 %v282_v17, %v282_v17  ;;  %s1232_s6 = smov 104   ;;  %vm250_vm12 = vcmask 419104  }
  0x10   : > { %v187_v3 = vld [vmem:[%s1294_s17] sm:$0xf]  ;;  %v1131_v5 = vpack.c.bf16 %v177_v2, %v177_v2  ;;  %v1139_v20 = vpack.c.bf16 %v262_v18, %v262_v18  ;;  %v272_v21 = vld [vmem:[%s1294_s17 + $0x4] sm:$0xf]  ;;  %vm260_vm13 = vcmask 583104   ;;  %vm270_vm14 = vcmask 747104  }
  0x11   : > { %v197_v6 = vld [vmem:[%s1294_s17] sm:$0xf]  ;;  %222 = vrot.lane.b32.xlu1 %v1135_v4, %s1217_s18  ;;  %v1132_v7 = vpack.c.bf16 %v187_v3, %v187_v3  ;;  %v297_v22 = vld [vmem:[%s1294_s17 + $0x4] sm:$0xf]  ;;  %v1140_v23 = vpack.c.bf16 %v272_v21, %v272_v21  ;;  %vm293_vm15 = vcmask 1042336   ;;  %vm294_vm1 = vcmask 29700  }
  0x12   : > { %182 = vrot.lane.b32.xlu0 %v1131_v5, %s1218_s19  ;;  %v1133_v8 = vpack.c.bf16 %v197_v6, %v197_v6  ;;  %v207_v9 = vld [vmem:[%s1294_s17] sm:$0xf]  ;;  %v1142_v24 = vpack.c.bf16 %v297_v22, %v297_v22  ;;  %v307_v25 = vld [vmem:[%s1294_s17 + $0x4] sm:$0xf]  ;;  %vm290_vm2 = vcmask 687104   ;;  %vm315_vm6 = vcmask 353504  }
  0x13   : > { %v232_v10 = vld [vmem:[%s1294_s17] sm:$0xf]  ;;  %v1134_v11 = vpack.c.bf16 %v207_v9, %v207_v9  ;;  %v317_v26 = vld [vmem:[%s1294_s17 + $0x4] sm:$0xf]  ;;  %v1143_v27 = vpack.c.bf16 %v307_v25, %v307_v25  ;;  %vm325_vm7 = vcmask 517504   ;;  %s1233_s7 = smov 86  }
  0x14   : > { %v1136_v12 = vpack.c.bf16 %v232_v10, %v232_v10  ;;  %v242_v13 = vld [vmem:[%s1294_s17] sm:$0xf]  ;;  %v1144_v28 = vpack.c.bf16 %v317_v26, %v317_v26  ;;  %v327_v29 = vld [vmem:[%s1294_s17 + $0x4] sm:$0xf]  ;;  %s1234_s8 = smov 126   ;;  %s1235_s9 = smov 124  }
  0x15   : > { %202 = vrot.lane.b32.xlu1 %v1133_v8, %s1220_s21  ;;  %v252_v14 = vld [vmem:[%s1294_s17] sm:$0xf]  ;;  %v1137_v15 = vpack.c.bf16 %v242_v13, %v242_v13  ;;  %v337_v30 = vld [vmem:[%s1294_s17 + $0x4] sm:$0xf]  ;;  %v1145_v31 = vpack.c.bf16 %v327_v29, %v327_v29  ;;  %s1236_s10 = smov 65   ;;  %s1237_s11 = smov 67  }
  0x16   : > { %192 = vrot.lane.b32.xlu0 %v1132_v7, %s1219_s20  ;;  %v1138_v16 = vpack.c.bf16 %v252_v14, %v252_v14  ;;  %v1146_v32 = vpack.c.bf16 %v337_v30, %v337_v30  ;;  %s1238_s14 = smov 66   ;;  %s1239_s15 = smov 85   ;;  %v1358_v56 = vld [vmem:[%s1445_s1] sm:$0xff] }
  0x17   : > { %s1240_s16 = smov 105   ;;  %s1241_s17 = smov 87   ;;  %v1097_v57 = vcombine.high %v1358_v56, %v1358_v56  ;;  %v693_v58 = vld [vmem:[%s1446_s2] sm:$0xff] }
  0x18   : > { %s1242_s18 = smov 107   ;;  %s1244_s21 = smov 46  }
  0x19   : > { %237 = vrot.lane.b32.xlu1 %v1136_v12, %s1222_s23 }
  0x1a   : > { %212 = vrot.lane.b32.xlu0 %v1134_v11, %s1221_s22 }
  0x1d   : > { %257 = vrot.lane.b32.xlu1 %v1138_v16, %s1224_s25 }
  0x1e   : > { %247 = vrot.lane.b32.xlu0 %v1137_v15, %s1223_s24 }
  0x21   : > { %267 = vrot.lane.b32.xlu1 %v1139_v20, %s1226_s27  ;;  %s1247_s27 = smov 70  }
  0x22   : > { %287 = vrot.lane.b32.xlu0 %v1141_v19, %s1225_s26 }
  0x25   : > { %302 = vrot.lane.b32.xlu1 %v1142_v24, %s1228_s29 }
  0x26   : > { %277 = vrot.lane.b32.xlu0 %v1140_v23, %s1227_s28  ;;  %s1248_s28 = smov 122  }
  0x29   : > { %322 = vrot.lane.b32.xlu1 %v1144_v28, %s1230_s4  ;;  %s1251_s4 = smov 110  }
  0x2a   : > { %312 = vrot.lane.b32.xlu0 %v1143_v27, %s1229_s30  ;;  %s1250_s30 = smov 114  }
  0x2d   : > { %342 = vrot.lane.b32.xlu1 %v1146_v32, %s1232_s6  ;;  %s1253_s6 = smov 102  }
  0x2e   : > { %332 = vrot.lane.b32.xlu0 %v1145_v31, %s1231_s5  ;;  %s1252_s5 = smov 94  }
  0x83   : > { %v223_v33 = vpop.permute.xlu1 %222 }
  0x84   : > { %v183_v34 = vpop.permute.xlu0 %182  ;;  %v224_v37 = vrot.slane %v223_v33, 4 }
  0x85   : > { %186 = vst.msk [vmem:[#allocation2] sm:$0x3] %vm185_vm3, %v183_v34  ;;  %vm280_vm3 = vcmask 911104  }
  0x86   : > { %v226_v40 = vsel %vm225_vm8, %v224_v37, %v223_v33  ;;  %vm335_vm8 = vcmask 681504  }
  0x87   : > { %v203_v36 = vpop.permute.xlu1 %202 }
  0x88   : > { %v193_v35 = vpop.permute.xlu0 %192 }
  0x89   : > { %196 = vst.msk [vmem:[#allocation2] sm:$0x3] %vm195_vm4, %v193_v35  ;;  %vm295_vm4 = vmor %vm294_vm1, %vm293_vm15  ;;  %vm543_vm15 = vcmask 1014784   ;;  %vm503_vm1 = vcmask 531456  }
  0x8a   : > { %206 = vst.msk [vmem:[#allocation2] sm:$0x3] %vm205_vm5, %v203_v36  ;;  %vm305_vm5 = vcmask 189504  }
  0x8b   : > { %v238_v39 = vpop.permute.xlu1 %237 }
  0x8c   : > { %v213_v38 = vpop.permute.xlu0 %212 }
  0x8d   : > { %216 = vst.msk [vmem:[#allocation2] sm:$0x3] %vm215_vm9, %v213_v38  ;;  %vm345_vm9 = vcmask 845504  }
  0x8e   : > { %231 = vst.msk [vmem:[#allocation2] sm:$0x33] %vm230_vm10, %v226_v40  ;;  %vm849_vm10 = vcmask 130048  }
  0x8f   : > { %241 = vst.msk [vmem:[#allocation2 + $0x4] sm:$0x3] %vm240_vm11, %v238_v39  ;;  %v258_v42 = vpop.permute.xlu1 %257  ;;  %1126 = vmatprep.mubr.msk.bf16.mxu1 %vm849_vm10, %v1097_v57  ;;  %1125 = vmatprep.mubr.msk.bf16.mxu0 %vm849_vm10, %v1097_v57  ;;  %vm613_vm11 = vcmask 392192  }
  0x90   : > { %v248_v41 = vpop.permute.xlu0 %247 }
  0x91   : > { %251 = vst.msk [vmem:[#allocation2 + $0x4] sm:$0x3] %vm250_vm12, %v248_v41  ;;  %vm561_vm12 = vcmask 719872  }
  0x92   : > { %261 = vst.msk [vmem:[#allocation2 + $0x4] sm:$0x3] %vm260_vm13, %v258_v42  ;;  %vm431_vm13 = vcmask 703488  }
  0x93   : > { %v268_v44 = vpop.permute.xlu1 %267 }
  0x94   : > { %v288_v43 = vpop.permute.xlu0 %287  ;;  %271 = vst.msk [vmem:[#allocation2 + $0x4] sm:$0x3] %vm270_vm14, %v268_v44  ;;  %vm525_vm14 = vcmask 1031168  }
  0x95   : > { %v289_v45 = vrot.slane %v288_v43, 4 }
  0x97   : > { %v303_v47 = vpop.permute.xlu1 %302  ;;  %v291_v48 = vsel %vm290_vm2, %v289_v45, %v288_v43 }
  0x98   : > { %v278_v46 = vpop.permute.xlu0 %277 }
  0x99   : > { %281 = vst.msk [vmem:[#allocation2 + $0x4] sm:$0x3] %vm280_vm3, %v278_v46  ;;  %vm485_vm3 = vcmask 539648  }
  0x9a   : > { %296 = vst.msk [vmem:[#allocation2 + $0x4] sm:$0x33] %vm295_vm4, %v291_v48  ;;  %vm449_vm4 = vcmask 695296  }
  0x9b   : > { %306 = vst.msk [vmem:[#allocation2 + $0x8] sm:$0x3] %vm305_vm5, %v303_v47  ;;  %v323_v50 = vpop.permute.xlu1 %322  ;;  %vm395_vm5 = vcmask 859136  }
  0x9c   : > { %v313_v49 = vpop.permute.xlu0 %312 }
  0x9d   : > { %316 = vst.msk [vmem:[#allocation2 + $0x8] sm:$0x3] %vm315_vm6, %v313_v49  ;;  %vm413_vm6 = vcmask 711680  }
  0x9e   : > { %326 = vst.msk [vmem:[#allocation2 + $0x8] sm:$0x3] %vm325_vm7, %v323_v50  ;;  %vm359_vm7 = vcmask 875520  }
  0x9f   : > { %v343_v52 = vpop.permute.xlu1 %342 }
  0xa0   : > { %v333_v51 = vpop.permute.xlu0 %332 }
  0xa1   : > { %336 = vst.msk [vmem:[#allocation2 + $0x8] sm:$0x3] %vm335_vm8, %v333_v51  ;;  %v1319_v53 = vld [vmem:[#allocation2] sm:$0xff]  ;;  %vm377_vm8 = vcmask 867328  }
  0xa2   : > { %346 = vst.msk [vmem:[#allocation2 + $0x8] sm:$0x3] %vm345_vm9, %v343_v52  ;;  %589 = vrot.lane.b32.xlu0 %v1319_v53, %s1225_s26  ;;  %vm631_vm9 = vcmask 375808  }
  0xa6   : > { %606 = vrot.lane.b32.xlu0 %v1319_v53, %s1219_s20 }
  0xa9   : > { %v511_v54 = vld [vmem:[#allocation2 + $0x8] sm:$0xf] }
  0xaa   : > { %v586_v55 = vld [vmem:[#allocation2 + $0x8] sm:$0xff]  ;;  %513 = vst [vmem:[#allocation3 + $0x74] sm:$0xf] %v511_v54  ;;  %554 = vrot.lane.b32.xlu0 %v1319_v53, %s1228_s29 }
  0xab   : > { %591 = vrot.lane.b32.xlu1 %v586_v55, %s1225_s26  ;;  %s1246_s26 = smov 78  }
  0xae   : > { %572 = vrot.lane.b32.xlu0 %v1319_v53, %s1233_s7 }
  0xaf   : > { %608 = vrot.lane.b32.xlu1 %v586_v55, %s1219_s20  ;;  %s1243_s20 = smov 106  }
  0xb2   : > { %518 = vrot.lane.b32.xlu0 %v1319_v53, %s1234_s8 }
  0xb3   : > { %556 = vrot.lane.b32.xlu1 %v586_v55, %s1228_s29  ;;  %s1249_s29 = smov 118  }
  0xb6   : > { %536 = vrot.lane.b32.xlu0 %v1319_v53, %s1235_s9 }
  0xb7   : > { %574 = vrot.lane.b32.xlu1 %v586_v55, %s1233_s7 }
  0xba   : > { %496 = vrot.lane.b32.xlu0 %v1319_v53, %s1236_s10 }
  0xbb   : > { %520 = vrot.lane.b32.xlu1 %v586_v55, %s1234_s8 }
  0xbe   : > { %460 = vrot.lane.b32.xlu0 %v1319_v53, %s1237_s11 }
  0xbf   : > { %538 = vrot.lane.b32.xlu1 %v586_v55, %s1235_s9  ;;  %s1254_s9 = smov 90  }
  0xc2   : > { %478 = vrot.lane.b32.xlu0 %v1319_v53, %s1238_s14 }
  0xc3   : > { %498 = vrot.lane.b32.xlu1 %v586_v55, %s1236_s10  ;;  %s1255_s10 = smov 98  }
  0xc6   : > { %424 = vrot.lane.b32.xlu0 %v1319_v53, %s1233_s7 }
  0xc7   : > { %462 = vrot.lane.b32.xlu1 %v586_v55, %s1237_s11  ;;  %s1130_s11 = sshll.u32 %s1449_s13, 4 }
  0xca   : > { %442 = vrot.lane.b32.xlu0 %v1319_v53, %s1239_s15 }
  0xcb   : > { %480 = vrot.lane.b32.xlu1 %v586_v55, %s1238_s14 }
  0xce   : > { %388 = vrot.lane.b32.xlu0 %v1319_v53, %s1240_s16 }
  0xcf   : > { %426 = vrot.lane.b32.xlu1 %v586_v55, %s1233_s7 }
  0xd2   : > { %406 = vrot.lane.b32.xlu0 %v1319_v53, %s1241_s17 }
  0xd3   : > { %444 = vrot.lane.b32.xlu1 %v586_v55, %s1239_s15 }
  0xd6   : > { %351 = vrot.lane.b32.xlu0 %v1319_v53, %s1242_s18 }
  0xd7   : > { %390 = vrot.lane.b32.xlu1 %v586_v55, %s1240_s16 }
  0xda   : > { %370 = vrot.lane.b32.xlu0 %v1319_v53, %s1243_s20 }
  0xdb   : > { %408 = vrot.lane.b32.xlu1 %v586_v55, %s1241_s17  ;;  %s1411_s17 = scalar_lea.vmem %s1447_s3, %s1130_s11 }
  0xde   : > { %624 = vrot.lane.b32.xlu0 %v1319_v53, %s1244_s21 }
  0xdf   : > { %353 = vrot.lane.b32.xlu1 %v586_v55, %s1242_s18 }
  0xe2   : > { %642 = vrot.lane.b32.xlu0 %v1319_v53, %s1218_s19 }
  0xe3   : > { %372 = vrot.lane.b32.xlu1 %v586_v55, %s1243_s20 }
  0xe6   : > { %696 = vperm.xlu0 %1196, %v693_v58  }
  0xe7   : > { %626 = vrot.lane.b32.xlu1 %v586_v55, %s1244_s21 }
  0xeb   : > { %644 = vrot.lane.b32.xlu1 %v586_v55, %s1218_s19  ;;  %s1245_s19 = smov 74  }
 0x114   : > { %v590_v59 = vpop.permute.xlu0 %589 }
 0x115   : > { %v593_v63 = vrot.slane %v590_v59, 4 }
 0x118   : > { %v607_v60 = vpop.permute.xlu0 %606 }
 0x119   : > { %v610_v7 = vrot.slane %v607_v60, 4 }
 0x11c   : > { %v555_v62 = vpop.permute.xlu0 %554 }
 0x11d   : > { %v592_v61 = vpop.permute.xlu1 %591  ;;  %v558_v14 = vrot.slane %v555_v62, 4 }
 0x11e   : > { %v594_v1 = vrot.slane %v592_v61, 4 }
 0x120   : > { %v595_v2 = vsel %vm173_vm0, %v593_v63, %v594_v1  ;;  %v597_v3 = vsel %vm290_vm2, %v592_v61, %v594_v1  ;;  %v573_v6 = vpop.permute.xlu0 %572 }
 0x121   : > { %v596_v4 = vsel %vm290_vm2, %v590_v59, %v595_v2  ;;  %601 = vst [vmem:[#allocation3 + $0xb0] sm:$0xf] %v597_v3  ;;  %v609_v5 = vpop.permute.xlu1 %608  ;;  %v576_v23 = vrot.slane %v573_v6, 4  ;;  %vm467_vm2 = vcmask 547840  }
 0x122   : > { %v611_v8 = vrot.slane %v609_v5, 4 }
 0x124   : > { %v612_v9 = vsel %vm173_vm0, %v610_v7, %v611_v8  ;;  %v615_v10 = vsel %vm613_vm11, %v609_v5, %v611_v8  ;;  %v519_v13 = vpop.permute.xlu0 %518 }
 0x125   : > { %v614_v11 = vsel %vm613_vm11, %v607_v60, %v612_v9  ;;  %619 = vst [vmem:[#allocation3 + $0xbc] sm:$0xf] %v615_v10  ;;  %v557_v12 = vpop.permute.xlu1 %556  ;;  %v522_v31 = vrot.slane %v519_v13, 4  ;;  %vm649_vm11 = vcmask 359424  }
 0x126   : > { %v559_v15 = vrot.slane %v557_v12, 4  ;;  %v1120_v16 = vcombine.high %v596_v4, %v614_v11  ;;  %v1119_v17 = vcombine.low %v596_v4, %v614_v11 }
 0x128   : > { %v560_v18 = vsel %vm173_vm0, %v558_v14, %v559_v15  ;;  %v563_v19 = vsel %vm561_vm12, %v557_v12, %v559_v15  ;;  %853 = vmatprep.subr.bf16.mxu0 %v1120_v16  ;;  %v537_v22 = vpop.permute.xlu0 %536 }
 0x129   : > { %v562_v20 = vsel %vm561_vm12, %v555_v62, %v560_v18  ;;  %567 = vst [vmem:[#allocation3 + $0x98] sm:$0xf] %v563_v19  ;;  %v575_v21 = vpop.permute.xlu1 %574  ;;  %854 = vmatpush1.bf16.msra.mxu0 %v1119_v17  ;;  %v540_v40 = vrot.slane %v537_v22, 4  ;;  %vm947_vm12 = vcmask 392448  }
 0x12a   : > { %v577_v24 = vrot.slane %v575_v21, 4 }
 0x12c   : > { %v578_v25 = vsel %vm173_vm0, %v576_v23, %v577_v24  ;;  %v580_v26 = vsel %vm431_vm13, %v575_v21, %v577_v24  ;;  %v1197_v27 = vld [vmem:[#allocation3 + $0xb0] ss:$12 sps:$4 sm:$0xff]   ;;  %v497_v30 = vpop.permute.xlu0 %496 }
 0x12d   : > { %v579_v28 = vsel %vm431_vm13, %v573_v6, %v578_v25  ;;  %584 = vst [vmem:[#allocation3 + $0xa4] sm:$0xf] %v580_v26  ;;  %v521_v29 = vpop.permute.xlu1 %520  ;;  %895 = vmatpush1.bf16.msra.mxu1 %v1197_v27  ;;  %v500_v48 = vrot.slane %v497_v30, 4 }
 0x12e   : > { %v523_v32 = vrot.slane %v521_v29, 4  ;;  %v1117_v33 = vcombine.high %v562_v20, %v579_v28  ;;  %v1116_v34 = vcombine.low %v562_v20, %v579_v28  ;;  %896 = vmatprep.subr.bf16.mxu1 %v1216_v0 }
 0x130   : > { %v524_v35 = vsel %vm173_vm0, %v522_v31, %v523_v32  ;;  %v527_v36 = vsel %vm525_vm14, %v521_v29, %v523_v32  ;;  %855 = vmatprep.subr.bf16.mxu0 %v1117_v33  ;;  %v461_v39 = vpop.permute.xlu0 %460 }
 0x131   : > { %v526_v37 = vsel %vm525_vm14, %v519_v13, %v524_v35  ;;  %531 = vst [vmem:[#allocation3 + $0x80] sm:$0xf] %v527_v36  ;;  %v539_v38 = vpop.permute.xlu1 %538  ;;  %856 = vmatpush1.bf16.msra.mxu0 %v1116_v34  ;;  %v464_v59 = vrot.slane %v461_v39, 4  ;;  %vm957_vm14 = vcmask 654848  }
 0x132   : > { %v541_v41 = vrot.slane %v539_v38, 4 }
 0x134   : > { %v542_v42 = vsel %vm173_vm0, %v540_v40, %v541_v41  ;;  %v545_v43 = vsel %vm543_vm15, %v539_v38, %v541_v41  ;;  %v1198_v44 = vld [vmem:[#allocation3 + $0x98] ss:$12 sps:$4 sm:$0xff]   ;;  %v479_v47 = vpop.permute.xlu0 %478 }
 0x135   : > { %v544_v45 = vsel %vm543_vm15, %v537_v22, %v542_v42  ;;  %549 = vst [vmem:[#allocation3 + $0x8c] sm:$0xf] %v545_v43  ;;  %v499_v46 = vpop.permute.xlu1 %498  ;;  %897 = vmatpush1.bf16.msra.mxu1 %v1198_v44  ;;  %v482_v6 = vrot.slane %v479_v47, 4  ;;  %vm962_vm15 = vcmask 786048  }
 0x136   : > { %v501_v49 = vrot.slane %v499_v46, 4  ;;  %v1114_v50 = vcombine.high %v526_v37, %v544_v45  ;;  %v1113_v51 = vcombine.low %v526_v37, %v544_v45  ;;  %898 = vmatprep.subr.bf16.mxu1 %v1216_v0 }
 0x138   : > { %v502_v52 = vsel %vm173_vm0, %v500_v48, %v501_v49  ;;  %v505_v54 = vsel %vm503_vm1, %v499_v46, %v501_v49  ;;  %857 = vmatprep.subr.bf16.mxu0 %v1114_v50  ;;  %v425_v58 = vpop.permute.xlu0 %424 }
 0x139   : > { %v504_v55 = vsel %vm503_vm1, %v497_v30, %v502_v52  ;;  %509 = vst [vmem:[#allocation3 + $0x68] sm:$0xf] %v505_v54  ;;  %v463_v57 = vpop.permute.xlu1 %462  ;;  %858 = vmatpush1.bf16.msra.mxu0 %v1113_v51  ;;  %v428_v13 = vrot.slane %v425_v58, 4  ;;  %vm1000_vm1 = vcmask 637952  }
 0x13a   : > { %v465_v60 = vrot.slane %v463_v57, 4  ;;  %v1111_v61 = vcombine.high %v504_v55, %v1319_v53  ;;  %v1110_v62 = vcombine.low %v504_v55, %v1319_v53 }
 0x13c   : > { %v466_v63 = vsel %vm173_vm0, %v464_v59, %v465_v60  ;;  %v469_v1 = vsel %vm467_vm2, %v463_v57, %v465_v60  ;;  %v1199_v2 = vld [vmem:[#allocation3 + $0x80] ss:$12 sps:$4 sm:$0xff]   ;;  %859 = vmatprep.subr.bf16.mxu0 %v1111_v61  ;;  %v443_v5 = vpop.permute.xlu0 %442 }
 0x13d   : > { %v468_v3 = vsel %vm467_vm2, %v461_v39, %v466_v63  ;;  %473 = vst [vmem:[#allocation3 + $0x50] sm:$0xf] %v469_v1  ;;  %v481_v4 = vpop.permute.xlu1 %480  ;;  %860 = vmatpush1.bf16.msra.mxu0 %v1110_v62  ;;  %899 = vmatpush1.bf16.msra.mxu1 %v1199_v2  ;;  %v446_v22 = vrot.slane %v443_v5, 4  ;;  %vm969_vm2 = vcmask 834560  }
 0x13e   : > { %v483_v7 = vrot.slane %v481_v4, 4  ;;  %900 = vmatprep.subr.bf16.mxu1 %v1216_v0 }
 0x140   : > { %v484_v8 = vsel %vm173_vm0, %v482_v6, %v483_v7  ;;  %v487_v9 = vsel %vm485_vm3, %v481_v4, %v483_v7  ;;  %v1200_v53 = vld [vmem:[#allocation3 + $0x68] ss:$12 sps:$4 sm:$0xff]   ;;  %v389_v12 = vpop.permute.xlu0 %388 }
 0x141   : > { %v486_v10 = vsel %vm485_vm3, %v479_v47, %v484_v8  ;;  %491 = vst [vmem:[#allocation3 + $0x5c] sm:$0xf] %v487_v9  ;;  %v427_v11 = vpop.permute.xlu1 %426  ;;  %901 = vmatpush1.bf16.msra.mxu1 %v1200_v53  ;;  %v392_v30 = vrot.slane %v389_v12, 4  ;;  %vm977_vm3 = vcmask 1048448  }
 0x142   : > { %v429_v14 = vrot.slane %v427_v11, 4  ;;  %v1108_v15 = vcombine.high %v468_v3, %v486_v10  ;;  %v1107_v16 = vcombine.low %v468_v3, %v486_v10  ;;  %902 = vmatprep.subr.bf16.mxu1 %v1216_v0 }
 0x144   : > { %v430_v17 = vsel %vm173_vm0, %v428_v13, %v429_v14  ;;  %v433_v18 = vsel %vm431_vm13, %v427_v11, %v429_v14  ;;  %861 = vmatprep.subr.bf16.mxu0 %v1108_v15  ;;  %v407_v21 = vpop.permute.xlu0 %406 }
 0x145   : > { %v432_v19 = vsel %vm431_vm13, %v425_v58, %v430_v17  ;;  %437 = vst [vmem:[#allocation3 + $0x38] sm:$0xf] %v433_v18  ;;  %v445_v20 = vpop.permute.xlu1 %444  ;;  %862 = vmatpush1.bf16.msra.mxu0 %v1107_v16  ;;  %v410_v38 = vrot.slane %v407_v21, 4  ;;  %v1096_v17 = vcombine.low %v1358_v56, %v1358_v56  ;;  %vm952_vm13 = vcmask 523648  }
 0x146   : > { %v447_v23 = vrot.slane %v445_v20, 4 }
 0x148   : > { %v448_v24 = vsel %vm173_vm0, %v446_v22, %v447_v23  ;;  %v451_v25 = vsel %vm449_vm4, %v445_v20, %v447_v23  ;;  %v1201_v26 = vld [vmem:[#allocation3 + $0x50] ss:$12 sps:$4 sm:$0xff]   ;;  %v352_v29 = vpop.permute.xlu0 %351 }
 0x149   : > { %v450_v27 = vsel %vm449_vm4, %v443_v5, %v448_v24  ;;  %455 = vst [vmem:[#allocation3 + $0x44] sm:$0xf] %v451_v25  ;;  %v391_v28 = vpop.permute.xlu1 %390  ;;  %903 = vmatpush1.bf16.msra.mxu1 %v1201_v26  ;;  %v355_v46 = vrot.slane %v352_v29, 4 }
 0x14a   : > { %v393_v31 = vrot.slane %v391_v28, 4  ;;  %v1105_v32 = vcombine.high %v432_v19, %v450_v27  ;;  %v1104_v33 = vcombine.low %v432_v19, %v450_v27  ;;  %904 = vmatprep.subr.bf16.mxu1 %v1216_v0 }
 0x14c   : > { %v394_v34 = vsel %vm173_vm0, %v392_v30, %v393_v31  ;;  %v397_v35 = vsel %vm395_vm5, %v391_v28, %v393_v31  ;;  %863 = vmatprep.subr.bf16.mxu0 %v1105_v32  ;;  %v371_v40 = vpop.permute.xlu0 %370 }
 0x14d   : > { %v396_v36 = vsel %vm395_vm5, %v389_v12, %v394_v34  ;;  %401 = vst [vmem:[#allocation3 + $0x20] sm:$0xf] %v397_v35  ;;  %v409_v37 = vpop.permute.xlu1 %408  ;;  %864 = vmatpush1.bf16.msra.mxu0 %v1104_v33  ;;  %v374_v57 = vrot.slane %v371_v40, 4 }
 0x14e   : > { %v411_v39 = vrot.slane %v409_v37, 4 }
 0x150   : > { %v412_v41 = vsel %vm173_vm0, %v410_v38, %v411_v39  ;;  %v415_v42 = vsel %vm413_vm6, %v409_v37, %v411_v39  ;;  %v1202_v43 = vld [vmem:[#allocation3 + $0x38] ss:$12 sps:$4 sm:$0xff]   ;;  %v625_v54 = vpop.permute.xlu0 %624 }
 0x151   : > { %v414_v44 = vsel %vm413_vm6, %v407_v21, %v412_v41  ;;  %419 = vst [vmem:[#allocation3 + $0x2c] sm:$0xf] %v415_v42  ;;  %v354_v45 = vpop.permute.xlu1 %353  ;;  %905 = vmatpush1.bf16.msra.mxu1 %v1202_v43  ;;  %v628_v1 = vrot.slane %v625_v54, 4 }
 0x152   : > { %v356_v47 = vrot.slane %v354_v45, 4  ;;  %v1102_v48 = vcombine.high %v396_v36, %v414_v44  ;;  %v1101_v49 = vcombine.low %v396_v36, %v414_v44  ;;  %906 = vmatprep.subr.bf16.mxu1 %v1216_v0 }
 0x154   : > { %v358_v50 = vsel %vm173_vm0, %v355_v46, %v356_v47  ;;  %v361_v51 = vsel %vm359_vm7, %v354_v45, %v356_v47  ;;  %865 = vmatprep.subr.bf16.mxu0 %v1102_v48  ;;  %v643_v5 = vpop.permute.xlu0 %642 }
 0x155   : > { %v360_v52 = vsel %vm359_vm7, %v352_v29, %v358_v50  ;;  %365 = vst [vmem:[#allocation3 + $0x8] sm:$0xf] %v361_v51  ;;  %v373_v55 = vpop.permute.xlu1 %372  ;;  %866 = vmatpush1.bf16.msra.mxu0 %v1101_v49  ;;  %v646_v53 = vrot.slane %v643_v5, 4 }
 0x156   : > { %v375_v58 = vrot.slane %v373_v55, 4 }
 0x158   : > { %v376_v59 = vsel %vm173_vm0, %v374_v57, %v375_v58  ;;  %v379_v60 = vsel %vm377_vm8, %v373_v55, %v375_v58  ;;  %v1203_v61 = vld [vmem:[#allocation3 + $0x20] ss:$12 sps:$4 sm:$0xff]  }
 0x159   : > { %v378_v62 = vsel %vm377_vm8, %v371_v40, %v376_v59  ;;  %383 = vst [vmem:[#allocation3 + $0x14] sm:$0xf] %v379_v60  ;;  %v627_v63 = vpop.permute.xlu1 %626  ;;  %907 = vmatpush1.bf16.msra.mxu1 %v1203_v61 }
 0x15a   : > { %v629_v2 = vrot.slane %v627_v63, 4  ;;  %v1099_v3 = vcombine.high %v360_v52, %v378_v62  ;;  %v1098_v4 = vcombine.low %v360_v52, %v378_v62  ;;  %908 = vmatprep.subr.bf16.mxu1 %v1216_v0 }
 0x15c   : > { %v630_v6 = vsel %vm173_vm0, %v628_v1, %v629_v2  ;;  %v633_v7 = vsel %vm631_vm9, %v627_v63, %v629_v2  ;;  %867 = vmatprep.subr.bf16.mxu0 %v1099_v3 }
 0x15d   : > { %v632_v8 = vsel %vm631_vm9, %v625_v54, %v630_v6  ;;  %637 = vst [vmem:[#allocation3 + $0xc8] sm:$0xf] %v633_v7  ;;  %v645_v9 = vpop.permute.xlu1 %644  ;;  %868 = vmatpush1.bf16.msra.mxu0 %v1098_v4 }
 0x15e   : > { %v647_v10 = vrot.slane %v645_v9, 4 }
 0x160   : > { %v648_v11 = vsel %vm173_vm0, %v646_v53, %v647_v10  ;;  %v651_v12 = vsel %vm649_vm11, %v645_v9, %v647_v10  ;;  %v1204_v13 = vld [vmem:[#allocation3 + $0x8] ss:$12 sps:$4 sm:$0xff]   ;;  %vm942_vm0 = vcmask 261248  }
 0x161   : > { %v650_v14 = vsel %vm649_vm11, %v643_v5, %v648_v11  ;;  %655 = vst [vmem:[#allocation3 + $0xd4] sm:$0xf] %v651_v12  ;;  %909 = vmatpush1.bf16.msra.mxu1 %v1204_v13  ;;  %v697_v21 = vpop.permute.xlu0 %696 }
 0x162   : > { %v1123_v15 = vcombine.high %v632_v8, %v650_v14  ;;  %v1122_v16 = vcombine.low %v632_v8, %v650_v14  ;;  %924 = vmatprep.subr.bf16.mxu1 %v1216_v0 }
 0x164   : > { %883 = vmatprep.subr.bf16.mxu0 %v1123_v15 }
 0x165   : > { %884 = vmatpush2.bf16.msra.mxu0 %v1122_v16 }
 0x168   : > { %v1205_v18 = vld [vmem:[#allocation3 + $0xc8] ss:$12 sps:$4 sm:$0xff]   ;;  %886 = vmatmul.mubr.bf16.vlgmr.msra.gmra.mxu0 %v1096_v17 }
 0x169   : > { %925 = vmatpush2.bf16.msra.mxu1 %v1205_v18 }
 0x16c   : > { %927 = vmatmul.mubr.bf16.vlgmr.msra.gmra.mxu1 %v1096_v17 }
 0x228   : > { %v887_v19 = vpop.f32.mrf.mxu0 }
 0x229   : > { %v888_v27 = vadd.f32 %v887_v19, %v697_v21 }
 0x22a   : > { %v889_v20 = vpop.f32.mrf.mxu0 }
 0x22b   : > { %v890_v28 = vadd.f32 %v889_v20, %v697_v21 }
 0x22c   : > { %v891_v22 = vpop.f32.mrf.mxu0  ;;  %v928_v23 = vpop.f32.mrf.mxu1 }
 0x22d   : > { %v929_v24 = vadd.f32 %v928_v23, %v697_v21 }
 0x22e   : > { %v892_v25 = vpop.f32.mrf.mxu0  ;;  %v930_v26 = vpop.f32.mrf.mxu1 }
 0x22f   : > { %1004 = vrot.lane.b32.xlu0 %v929_v24, %s1245_s19  ;;  %998 = vrot.lane.b32.xlu1 %v929_v24, %s1246_s26 }
 0x230   : > { %v931_v0 = vpop.f32.mrf.mxu1 }
 0x232   : > { %v932_v56 = vpop.f32.mrf.mxu1 }
 0x233   : > { %1008 = vrot.lane.b32.xlu1 %v929_v24, %s1247_s27  ;;  %939 = vrot.lane.b32.xlu0 %v888_v27, %s1248_s28 }
 0x237   : > { %944 = vrot.lane.b32.xlu0 %v888_v27, %s1249_s29  ;;  %935 = vrot.lane.b32.xlu1 %v888_v27, %s1234_s8  ;;  %s1256_s8 = smov 82  }
 0x23b   : > { %949 = vrot.lane.b32.xlu0 %v888_v27, %s1250_s30  ;;  %959 = vrot.lane.b32.xlu1 %v888_v27, %s1243_s20 }
 0x23f   : > { %954 = vrot.lane.b32.xlu0 %v888_v27, %s1251_s4  ;;  %979 = vrot.lane.b32.xlu1 %v890_v28, %s1252_s5 }
 0x243   : > { %965 = vrot.lane.b32.xlu0 %v888_v27, %s1253_s6  ;;  %983 = vrot.lane.b32.xlu1 %v890_v28, %s1254_s9 }
 0x247   : > { %996 = vrot.lane.b32.xlu0 %v890_v28, %s1246_s26  ;;  %987 = vrot.lane.b32.xlu1 %v890_v28, %s1233_s7 }
 0x24b   : > { %974 = vrot.lane.b32.xlu0 %v890_v28, %s1255_s10  ;;  %991 = vrot.lane.b32.xlu1 %v890_v28, %s1256_s8 }
 0x24f   : > { %967 = vrot.lane.b32.xlu1 %v890_v28, %s1253_s6 }
 0x253   : > { %1012 = vrot.lane.b32.xlu1 %v929_v24, %s1238_s14 }
 0x2a1   : > { %v1005_v29 = vpop.permute.xlu0 %1004  ;;  %v999_v30 = vpop.permute.xlu1 %998 }
 0x2a5   : > { %v1009_v31 = vpop.permute.xlu1 %1008  ;;  %v940_v32 = vpop.permute.xlu0 %939 }
 0x2a9   : > { %v945_v33 = vpop.permute.xlu0 %944  ;;  %v936_v34 = vpop.permute.xlu1 %935 }
 0x2aa   : > { %938 = vst.msk [vmem:[%s1411_s17] sm:$0xff] %vm849_vm10, %v936_v34 }
 0x2ab   : > { %943 = vst.msk [vmem:[%s1411_s17] sm:$0xff] %vm942_vm0, %v940_v32 }
 0x2ac   : > { %948 = vst.msk [vmem:[%s1411_s17] sm:$0xff] %vm947_vm12, %v945_v33 }
 0x2ad   : > { %v950_v35 = vpop.permute.xlu0 %949  ;;  %v960_v36 = vpop.permute.xlu1 %959 }
 0x2ae   : > { %953 = vst.msk [vmem:[%s1411_s17] sm:$0xff] %vm952_vm13, %v950_v35 }
 0x2b1   : > { %v955_v37 = vpop.permute.xlu0 %954  ;;  %v980_v38 = vpop.permute.xlu1 %979 }
 0x2b2   : > { %958 = vst.msk [vmem:[%s1411_s17] sm:$0xff] %vm957_vm14, %v955_v37 }
 0x2b3   : > { %982 = vst.msk [vmem:[%s1411_s17 + $0x8] sm:$0xff] %vm849_vm10, %v980_v38  ;;  %vm972_vm10 = vcmask 917248  }
 0x2b4   : > { %963 = vst.msk [vmem:[%s1411_s17] sm:$0xff] %vm962_vm15, %v960_v36 }
 0x2b5   : > { %v966_v39 = vpop.permute.xlu0 %965  ;;  %v984_v40 = vpop.permute.xlu1 %983 }
 0x2b6   : > { %986 = vst.msk [vmem:[%s1411_s17 + $0x8] sm:$0xff] %vm942_vm0, %v984_v40 }
 0x2b9   : > { %v988_v41 = vpop.permute.xlu1 %987  ;;  %v997_v42 = vpop.permute.xlu0 %996 }
 0x2ba   : > { %990 = vst.msk [vmem:[%s1411_s17 + $0x8] sm:$0xff] %vm947_vm12, %v988_v41  ;;  %v1001_v44 = vsel %vm1000_vm1, %v997_v42, %v999_v30 }
 0x2bd   : > { %v992_v43 = vpop.permute.xlu1 %991  ;;  %v975_v47 = vpop.permute.xlu0 %974 }
 0x2be   : > { %994 = vst.msk [vmem:[%s1411_s17 + $0x8] sm:$0xff] %vm952_vm13, %v992_v43 }
 0x2bf   : > { %1003 = vst.msk [vmem:[%s1411_s17 + $0x8] sm:$0xff] %vm957_vm14, %v1001_v44 }
 0x2c0   : > { %1007 = vst.msk [vmem:[%s1411_s17 + $0x8] sm:$0xff] %vm962_vm15, %v1005_v29 }
 0x2c1   : > { %v968_v45 = vpop.permute.xlu1 %967  ;;  %1011 = vst.msk [vmem:[%s1411_s17 + $0x8] sm:$0xff] %vm972_vm10, %v1009_v31 }
 0x2c2   : > { %v970_v46 = vsel %vm969_vm2, %v966_v39, %v968_v45 }
 0x2c3   : > { %973 = vst.msk [vmem:[%s1411_s17] sm:$0xff] %vm972_vm10, %v970_v46 }
 0x2c4   : > { %978 = vst.msk [vmem:[%s1411_s17] sm:$0xff] %vm977_vm3, %v975_v47 }
 0x2c5   : > { %v1013_v48 = vpop.permute.xlu1 %1012 }
 0x2c6   : > { %1015 = vst.msk [vmem:[%s1411_s17 + $0x8] sm:$0xff] %vm977_vm3, %v1013_v48 }
 0x2c7 PF: > { %s13_s12 = sadd.s32 1, %s1214_s12  }
 0x2c8   : > { %p10_p4 = scmp.ge.s32.totalorder %s13_s12, 4  }
 0x2ca   :  { %12 = sbr.rel (!%p10_p4) target bundleno = 1 (0x1), region = 62 }

</bundles_post_ra>
